<compile_context>
chip_gen: v6e
topology: v6e:2x2x1
jax: 0.10.0
libtpu: 0.0.40
codegen_flags: <defaults>
</compile_context>

<pallas_src>
import functools
import math

import jax
import jax.numpy as jnp
from jax import lax
from jax.experimental import pallas as pl
from jax.experimental.pallas import tpu as pltpu


# ----------------------------------------------------------------------------
# Fused Pallas kernel: embedded features -> all GT layers -> MLP readout
# ----------------------------------------------------------------------------
def san_fused_kernel(h0_ref, adj_ref,
                     wq_ref, wk_ref, wv_ref, wq2_ref, wk2_ref,
                     wo_ref, bo_ref, ln1g_ref, ln1b_ref,
                     w1_ref, b1_ref, w2_ref, b2_ref, ln2g_ref, ln2b_ref,
                     mw0_ref, mb0_ref, mw1_ref, mb1_ref, mw2_ref, mb2_ref,
                     out_ref, *, num_layers, num_heads, head_dim, gamma):
    f32, bf16 = jnp.float32, jnp.bfloat16
    h0 = h0_ref[...]                                   # (N, D) f32
    n, d = h0.shape
    H, dh = num_heads, head_dim

    # --- graph masks: computed once, shared by every layer -----------------------------
    adj = adj_ref[...].astype(jnp.int32)               # int8 -> int32 (1 = real edge)
    row = lax.broadcasted_iota(jnp.int32, (n, n), 0)
    col = lax.broadcasted_iota(jnp.int32, (n, n), 1)
    offdiag = row != col                                # no self-loops in the (full) graph
    is_real = jnp.logical_and(adj > 0, offdiag)         # bool (N, N) selector
    # single combined gate matrix (real: 1/(1+g), fake: g/(1+g), diagonal: 0)
    g_comb = jnp.where(offdiag,
                       jnp.where(is_real, 1.0 / (gamma + 1.0), gamma / (gamma + 1.0)),
                       0.0).astype(f32)                 # (N, N) f32 (only f32 N^2 slab kept)

    dn_qk = (((1,), (1,)), ((), ()))                    # 'nd,md->nm' (no explicit transpose)

    def layer_body(l, h):
        hb = h.astype(bf16)

        def proj(w_ref):                                # fat (N,D)@(D,D) bf16 matmul
            return jnp.dot(hb, w_ref[l], preferred_element_type=f32)

        Q = proj(wq_ref).astype(bf16)     # gate*1/sqrt(dh) folded into wq in the wrapper
        K = proj(wk_ref).astype(bf16)
        Q2 = proj(wq2_ref).astype(bf16)   # fake-edge gate folded in
        K2 = proj(wk2_ref).astype(bf16)
        V = proj(wv_ref).astype(bf16)

        # heads split only here (static 8-lane column slices); one exp per head.
        head_outs = []
        for hd in range(H):
            sl = slice(hd * dh, (hd + 1) * dh)
            s_real = lax.dot_general(Q[:, sl], K[:, sl], dn_qk,
                                     preferred_element_type=f32)     # (N, N)
            s_fake = lax.dot_general(Q2[:, sl], K2[:, sl], dn_qk,
                                     preferred_element_type=f32)
            s = jnp.where(is_real, s_real, s_fake)      # disjoint masks; diag gate is 0
            a = jnp.exp(jnp.clip(s, -5.0, 5.0)) * g_comb             # single exp / head
            z = jnp.sum(a, axis=-1, keepdims=True)      # XLU row-sum denominator (f32)
            wv_h = jnp.dot(a.astype(bf16), V[:, sl], preferred_element_type=f32)
            # NOTE: for N>=2 every row has an off-diagonal edge, so z >= exp(-5)*g/(1+g)>0.
            head_outs.append(wv_h * pl.reciprocal(z + 1e-6, approx=True))

        heads = jnp.concatenate(head_outs, axis=-1)     # (N, D) == concat over heads
        o = jnp.dot(heads.astype(bf16), wo_ref[l], preferred_element_type=f32)
        h1 = h + o + bo_ref[l]

        # LayerNorm (eps = 1e-5, PyTorch default)
        mu = jnp.mean(h1, axis=-1, keepdims=True)
        var = jnp.mean((h1 - mu) ** 2, axis=-1, keepdims=True)
        h1 = (h1 - mu) * lax.rsqrt(var + 1e-5) * ln1g_ref[l] + ln1b_ref[l]

        # FFN, residual, LayerNorm
        f = jnp.dot(h1.astype(bf16), w1_ref[l], preferred_element_type=f32) + b1_ref[l]
        f = jnp.maximum(f, 0.0)
        f = jnp.dot(f.astype(bf16), w2_ref[l], preferred_element_type=f32) + b2_ref[l]
        h2 = h1 + f
        mu2 = jnp.mean(h2, axis=-1, keepdims=True)
        var2 = jnp.mean((h2 - mu2) ** 2, axis=-1, keepdims=True)
        return (h2 - mu2) * lax.rsqrt(var2 + 1e-5) * ln2g_ref[l] + ln2b_ref[l]

    # small layer count -> full unroll is fine (keep unroll=False if GT_layers grows, v5e)
    h = lax.fori_loop(0, num_layers, layer_body, h0, unroll=True)

    # MLPReadout (L=2): Linear->ReLU -> Linear->ReLU -> Linear (last layer lane-padded)
    y = jnp.dot(h.astype(bf16), mw0_ref[...], preferred_element_type=f32) + mb0_ref[...]
    y = jnp.maximum(y, 0.0)
    y = jnp.dot(y.astype(bf16), mw1_ref[...], preferred_element_type=f32) + mb1_ref[...]
    y = jnp.maximum(y, 0.0)
    out_ref[...] = (jnp.dot(y.astype(bf16), mw2_ref[...], preferred_element_type=f32)
                    + mb2_ref[...])


# ----------------------------------------------------------------------------
# Wrapper: weight folding / layer stacking / lane padding + one pallas_call
# ----------------------------------------------------------------------------
def _vmem_specs(n):
    return [pl.BlockSpec(memory_space=pltpu.MemorySpace.VMEM) for _ in range(n)]


def san_forward(params, h_node_ids, adj_i8, *, num_heads, gamma, n_classes):
    # Embedding lookups + in_feat_dropout (p=0 -> identity): plain-JAX glue.
    h0 = params["emb_h"][h_node_ids].astype(jnp.float32)      # (N, D)
    e_real = params["emb_e"][1:2]                             # (1, D) embedding_e(1)
    e_fake = params["emb_e"][0:1]                             # (1, D) embedding_e(0)

    layers = params["layers"]
    num_layers = len(layers)
    N, D = h0.shape
    dh = D // num_heads
    scale = 1.0 / math.sqrt(dh)
    bf16 = jnp.bfloat16

    def stack(fn, dtype=None):
        w = jnp.stack([fn(lp) for lp in layers])
        return w.astype(dtype) if dtype is not None else w

    # On a full graph the per-edge E features collapse to two constant gate vectors;
    # fold gate * 1/sqrt(dh) into the Q / Q_2 weight columns. Weights kept as (L, D, D)
    # (fat matmuls in-kernel), MXU operands stored as bf16, biases/LN params stay f32.
    wq = stack(lambda lp: lp["wq"] * (jnp.dot(e_real, lp["we"]) * scale), bf16)
    wk = stack(lambda lp: lp["wk"], bf16)
    wv = stack(lambda lp: lp["wv"], bf16)
    wq2 = stack(lambda lp: lp["wq2"] * (jnp.dot(e_fake, lp["we2"]) * scale), bf16)
    wk2 = stack(lambda lp: lp["wk2"], bf16)
    wo = stack(lambda lp: lp["wo"], bf16)
    bo = stack(lambda lp: lp["bo"])
    ln1g = stack(lambda lp: lp["ln1g"])
    ln1b = stack(lambda lp: lp["ln1b"])
    w1 = stack(lambda lp: lp["w1"], bf16)
    b1 = stack(lambda lp: lp["b1"])
    w2 = stack(lambda lp: lp["w2"], bf16)
    b2 = stack(lambda lp: lp["b2"])
    ln2g = stack(lambda lp: lp["ln2g"])
    ln2b = stack(lambda lp: lp["ln2b"])

    # Lane-dense output: pad the final readout layer to a multiple of 128 columns.
    mlp = params["mlp"]
    n_pad = ((n_classes + 127) // 128) * 128
    mw0 = mlp["w0"].astype(bf16)
    mw1 = mlp["w1"].astype(bf16)
    mw2 = jnp.pad(mlp["w2"], ((0, 0), (0, n_pad - n_classes))).astype(bf16)
    mb2 = jnp.pad(mlp["b2"], ((0, 0), (0, n_pad - n_classes)))

    args = (h0, adj_i8,
            wq, wk, wv, wq2, wk2,
            wo, bo, ln1g, ln1b, w1, b1, w2, b2, ln2g, ln2b,
            mw0, mlp["b0"], mw1, mlp["b1"], mw2, mb2)

    # Cost estimate (matmul flops + exps) for XLA scheduling around the custom call.
    flops = (num_layers * (2 * N * D * D * 5                       # fat projections
                           + 4 * N * N * D                         # real+fake scores
                           + 2 * N * N * D                         # attn @ V
                           + 2 * N * D * D                         # O projection
                           + 8 * N * D * D)                        # FFN
             + 2 * N * (D * (D // 2) + (D // 2) * (D // 4) + (D // 4) * n_pad))
    transcendentals = num_layers * (num_heads * N * N + num_heads * N + 2 * N)
    bytes_accessed = sum(int(a.size) * a.dtype.itemsize for a in args) + N * n_pad * 4

    # VMEM budget from the actual live set (raises v5e's 16 MiB scoped default if needed,
    # capped below v7x's 64 MiB physical VMEM).
    temp_bytes = 4 * (3 * N * N + 14 * N * D + 2 * N * 2 * D)      # scores/gates/acts
    need = bytes_accessed + temp_bytes
    vmem_limit = int(min(64 * 2 ** 20, max(32 * 2 ** 20, 2 * need)))

    kern = functools.partial(san_fused_kernel, num_layers=num_layers,
                             num_heads=num_heads, head_dim=dh, gamma=gamma)
    out = pl.pallas_call(
        kern,
        out_shape=jax.ShapeDtypeStruct((N, n_pad), jnp.float32),
        in_specs=_vmem_specs(len(args)),
        out_specs=pl.BlockSpec(memory_space=pltpu.MemorySpace.VMEM),
        compiler_params=pltpu.CompilerParams(vmem_limit_bytes=vmem_limit),
        cost_estimate=pl.CostEstimate(flops=int(flops),
                                      transcendentals=int(transcendentals),
                                      bytes_accessed=int(bytes_accessed)),
    )(*args)
    return out[:, :n_classes]


# ----------------------------------------------------------------------------
# Deterministic parameter init (same structure/semantics as before)
# ----------------------------------------------------------------------------
def _rand(key, shape, scale=0.1):
    return scale * jax.random.normal(key, shape, dtype=jnp.float32)


def init_san_params(key, in_dim_node, hidden, n_layers, n_classes):
    keys = iter(jax.random.split(key, 16 + 20 * n_layers))
    params = {
        "emb_h": _rand(next(keys), (in_dim_node, hidden)),
        "emb_e": _rand(next(keys), (2, hidden)),
        "layers": [],
    }
    for _ in range(n_layers):
        lp = {
            "wq":  _rand(next(keys), (hidden, hidden)),
            "wk":  _rand(next(keys), (hidden, hidden)),
            "wv":  _rand(next(keys), (hidden, hidden)),
            "wq2": _rand(next(keys), (hidden, hidden)),
            "wk2": _rand(next(keys), (hidden, hidden)),
            "we":  _rand(next(keys), (hidden, hidden)),   # E  (real-edge feature proj)
            "we2": _rand(next(keys), (hidden, hidden)),   # E_2 (fake-edge feature proj)
            "wo":  _rand(next(keys), (hidden, hidden)),
            "bo":  _rand(next(keys), (1, hidden)),
            "ln1g": jnp.ones((1, hidden), jnp.float32),
            "ln1b": jnp.zeros((1, hidden), jnp.float32),
            "w1":  _rand(next(keys), (hidden, 2 * hidden)),
            "b1":  _rand(next(keys), (1, 2 * hidden)),
            "w2":  _rand(next(keys), (2 * hidden, hidden)),
            "b2":  _rand(next(keys), (1, hidden)),
            "ln2g": jnp.ones((1, hidden), jnp.float32),
            "ln2b": jnp.zeros((1, hidden), jnp.float32),
        }
        params["layers"].append(lp)
    d0, d1, d2 = hidden, hidden // 2, hidden // 4
    params["mlp"] = {
        "w0": _rand(next(keys), (d0, d1)), "b0": _rand(next(keys), (1, d1)),
        "w1": _rand(next(keys), (d1, d2)), "b1": _rand(next(keys), (1, d2)),
        "w2": _rand(next(keys), (d2, n_classes)), "b2": _rand(next(keys), (1, n_classes)),
    }
    return params


if __name__ == "__main__":
    # net_params: in_dim=8, n_classes=4, gamma=0.1, GT_layers=2,
    # GT_hidden_dim=GT_out_dim=32, GT_n_heads=4, full_graph=True,
    # residual=True, layer_norm=True, batch_norm=False, dropouts=0.
    N, IN_VOCAB, HIDDEN, HEADS, LAYERS, NCLASSES = 16, 8, 32, 4, 2, 4
    GAMMA = 0.1

    root = jax.random.PRNGKey(0)
    k_param, k_nodes, k_adj = jax.random.split(root, 3)

    params = init_san_params(k_param, IN_VOCAB, HIDDEN, LAYERS, NCLASSES)

    # Node token ids and a random symmetric adjacency (no self loops), int8 mask.
    h_node_ids = jax.random.randint(k_nodes, (N,), 0, IN_VOCAB)
    a = jax.random.bernoulli(k_adj, 0.3, (N, N)).astype(jnp.int32)
    a = jnp.triu(a, 1)
    adj = ((a + a.T) > 0).astype(jnp.int8)

    fwd = jax.jit(functools.partial(san_forward, num_heads=HEADS, gamma=GAMMA,
                                    n_classes=NCLASSES))
    logits = fwd(params, h_node_ids, adj)
    jax.block_until_ready(logits)
    assert logits.shape == (N, NCLASSES)
    print("KERNEL_OK")
</pallas_src>

<mosaic_0001>
module attributes {stable_mosaic.version = 11 : i64} {
  func.func @san_fused_kernel(%arg0: memref<16x32xf32, #tpu.memory_space<vmem>>, %arg1: memref<16x16xi8, #tpu.memory_space<vmem>>, %arg2: memref<2x32x32xbf16, #tpu.memory_space<vmem>>, %arg3: memref<2x32x32xbf16, #tpu.memory_space<vmem>>, %arg4: memref<2x32x32xbf16, #tpu.memory_space<vmem>>, %arg5: memref<2x32x32xbf16, #tpu.memory_space<vmem>>, %arg6: memref<2x32x32xbf16, #tpu.memory_space<vmem>>, %arg7: memref<2x32x32xbf16, #tpu.memory_space<vmem>>, %arg8: memref<2x1x32xf32, #tpu.memory_space<vmem>>, %arg9: memref<2x1x32xf32, #tpu.memory_space<vmem>>, %arg10: memref<2x1x32xf32, #tpu.memory_space<vmem>>, %arg11: memref<2x32x64xbf16, #tpu.memory_space<vmem>>, %arg12: memref<2x1x64xf32, #tpu.memory_space<vmem>>, %arg13: memref<2x64x32xbf16, #tpu.memory_space<vmem>>, %arg14: memref<2x1x32xf32, #tpu.memory_space<vmem>>, %arg15: memref<2x1x32xf32, #tpu.memory_space<vmem>>, %arg16: memref<2x1x32xf32, #tpu.memory_space<vmem>>, %arg17: memref<32x16xbf16, #tpu.memory_space<vmem>>, %arg18: memref<1x16xf32, #tpu.memory_space<vmem>>, %arg19: memref<16x8xbf16, #tpu.memory_space<vmem>>, %arg20: memref<1x8xf32, #tpu.memory_space<vmem>>, %arg21: memref<8x128xbf16, #tpu.memory_space<vmem>>, %arg22: memref<1x128xf32, #tpu.memory_space<vmem>>, %arg23: memref<16x128xf32, #tpu.memory_space<vmem>>) attributes {dimension_semantics = [], scalar_prefetch = 0 : i64, scratch_operands = 0 : i64, tpu.core_type = #tpu.core_type<tc>} {
    %c0 = arith.constant 0 : index
    %c0_0 = arith.constant 0 : index
    %0 = vector.load %arg0[%c0, %c0_0] : memref<16x32xf32, #tpu.memory_space<vmem>>, vector<16x32xf32>
    %c0_1 = arith.constant 0 : index
    %c0_2 = arith.constant 0 : index
    %1 = vector.load %arg1[%c0_1, %c0_2] : memref<16x16xi8, #tpu.memory_space<vmem>>, vector<16x16xi8>
    %2 = arith.extsi %1 : vector<16x16xi8> to vector<16x16xi32>
    %3 = tpu.iota {dimensions = array<i32: 0>} : vector<16x16xi32>
    %4 = tpu.iota {dimensions = array<i32: 1>} : vector<16x16xi32>
    %5 = arith.cmpi ne, %3, %4 : vector<16x16xi32>
    %c0_i32 = arith.constant 0 : i32
    %6 = vector.broadcast %c0_i32 : i32 to vector<16x16xi32>
    %7 = arith.cmpi sgt, %2, %6 : vector<16x16xi32>
    %8 = arith.andi %7, %5 : vector<16x16xi1>
    %cst = arith.constant 0.909090936 : f32
    %cst_3 = arith.constant 0.0909090936 : f32
    %9 = vector.broadcast %cst : f32 to vector<16x16xf32>
    %10 = vector.broadcast %cst_3 : f32 to vector<16x16xf32>
    %11 = arith.select %8, %9, %10 : vector<16x16xi1>, vector<16x16xf32>
    %cst_4 = arith.constant 0.000000e+00 : f32
    %12 = vector.broadcast %cst_4 : f32 to vector<16x16xf32>
    %13 = arith.select %5, %11, %12 : vector<16x16xi1>, vector<16x16xf32>
    %c0_i32_5 = arith.constant 0 : i32
    %14 = arith.truncf %0 : vector<16x32xf32> to vector<16x32xbf16>
    %15 = arith.index_cast %c0_i32_5 : i32 to index
    %c0_6 = arith.constant 0 : index
    %c0_7 = arith.constant 0 : index
    %16 = vector.load %arg2[%15, %c0_6, %c0_7] : memref<2x32x32xbf16, #tpu.memory_space<vmem>>, vector<1x32x32xbf16>
    %17 = vector.shape_cast %16 : vector<1x32x32xbf16> to vector<32x32xbf16>
    %cst_8 = arith.constant dense<0.000000e+00> : vector<16x32xf32>
    %18 = tpu.matmul %14, %17, %cst_8 {dimension_numbers = #tpu.dot_dimension_numbers<[1], [0], [0], [1], [0, 0, 1, 1], [], []>} : vector<16x32xbf16>, vector<32x32xbf16>, vector<16x32xf32> -> vector<16x32xf32>
    %19 = arith.truncf %18 : vector<16x32xf32> to vector<16x32xbf16>
    %20 = arith.index_cast %c0_i32_5 : i32 to index
    %c0_9 = arith.constant 0 : index
    %c0_10 = arith.constant 0 : index
    %21 = vector.load %arg3[%20, %c0_9, %c0_10] : memref<2x32x32xbf16, #tpu.memory_space<vmem>>, vector<1x32x32xbf16>
    %22 = vector.shape_cast %21 : vector<1x32x32xbf16> to vector<32x32xbf16>
    %cst_11 = arith.constant dense<0.000000e+00> : vector<16x32xf32>
    %23 = tpu.matmul %14, %22, %cst_11 {dimension_numbers = #tpu.dot_dimension_numbers<[1], [0], [0], [1], [0, 0, 1, 1], [], []>} : vector<16x32xbf16>, vector<32x32xbf16>, vector<16x32xf32> -> vector<16x32xf32>
    %24 = arith.truncf %23 : vector<16x32xf32> to vector<16x32xbf16>
    %25 = arith.index_cast %c0_i32_5 : i32 to index
    %c0_12 = arith.constant 0 : index
    %c0_13 = arith.constant 0 : index
    %26 = vector.load %arg5[%25, %c0_12, %c0_13] : memref<2x32x32xbf16, #tpu.memory_space<vmem>>, vector<1x32x32xbf16>
    %27 = vector.shape_cast %26 : vector<1x32x32xbf16> to vector<32x32xbf16>
    %cst_14 = arith.constant dense<0.000000e+00> : vector<16x32xf32>
    %28 = tpu.matmul %14, %27, %cst_14 {dimension_numbers = #tpu.dot_dimension_numbers<[1], [0], [0], [1], [0, 0, 1, 1], [], []>} : vector<16x32xbf16>, vector<32x32xbf16>, vector<16x32xf32> -> vector<16x32xf32>
    %29 = arith.truncf %28 : vector<16x32xf32> to vector<16x32xbf16>
    %30 = arith.index_cast %c0_i32_5 : i32 to index
    %c0_15 = arith.constant 0 : index
    %c0_16 = arith.constant 0 : index
    %31 = vector.load %arg6[%30, %c0_15, %c0_16] : memref<2x32x32xbf16, #tpu.memory_space<vmem>>, vector<1x32x32xbf16>
    %32 = vector.shape_cast %31 : vector<1x32x32xbf16> to vector<32x32xbf16>
    %cst_17 = arith.constant dense<0.000000e+00> : vector<16x32xf32>
    %33 = tpu.matmul %14, %32, %cst_17 {dimension_numbers = #tpu.dot_dimension_numbers<[1], [0], [0], [1], [0, 0, 1, 1], [], []>} : vector<16x32xbf16>, vector<32x32xbf16>, vector<16x32xf32> -> vector<16x32xf32>
    %34 = arith.truncf %33 : vector<16x32xf32> to vector<16x32xbf16>
    %35 = arith.index_cast %c0_i32_5 : i32 to index
    %c0_18 = arith.constant 0 : index
    %c0_19 = arith.constant 0 : index
    %36 = vector.load %arg4[%35, %c0_18, %c0_19] : memref<2x32x32xbf16, #tpu.memory_space<vmem>>, vector<1x32x32xbf16>
    %37 = vector.shape_cast %36 : vector<1x32x32xbf16> to vector<32x32xbf16>
    %cst_20 = arith.constant dense<0.000000e+00> : vector<16x32xf32>
    %38 = tpu.matmul %14, %37, %cst_20 {dimension_numbers = #tpu.dot_dimension_numbers<[1], [0], [0], [1], [0, 0, 1, 1], [], []>} : vector<16x32xbf16>, vector<32x32xbf16>, vector<16x32xf32> -> vector<16x32xf32>
    %39 = arith.truncf %38 : vector<16x32xf32> to vector<16x32xbf16>
    %40 = vector.extract_strided_slice %19 {offsets = [0, 0], sizes = [16, 8], strides = [1, 1]} : vector<16x32xbf16> to vector<16x8xbf16>
    %41 = vector.extract_strided_slice %24 {offsets = [0, 0], sizes = [16, 8], strides = [1, 1]} : vector<16x32xbf16> to vector<16x8xbf16>
    %cst_21 = arith.constant dense<0.000000e+00> : vector<16x16xf32>
    %42 = tpu.matmul %40, %41, %cst_21 {dimension_numbers = #tpu.dot_dimension_numbers<[1], [1], [0], [0], [0, 0, 1, 0], [], []>} : vector<16x8xbf16>, vector<16x8xbf16>, vector<16x16xf32> -> vector<16x16xf32>
    %43 = vector.extract_strided_slice %29 {offsets = [0, 0], sizes = [16, 8], strides = [1, 1]} : vector<16x32xbf16> to vector<16x8xbf16>
    %44 = vector.extract_strided_slice %34 {offsets = [0, 0], sizes = [16, 8], strides = [1, 1]} : vector<16x32xbf16> to vector<16x8xbf16>
    %cst_22 = arith.constant dense<0.000000e+00> : vector<16x16xf32>
    %45 = tpu.matmul %43, %44, %cst_22 {dimension_numbers = #tpu.dot_dimension_numbers<[1], [1], [0], [0], [0, 0, 1, 0], [], []>} : vector<16x8xbf16>, vector<16x8xbf16>, vector<16x16xf32> -> vector<16x16xf32>
    %46 = arith.select %8, %42, %45 : vector<16x16xi1>, vector<16x16xf32>
    %cst_23 = arith.constant -5.000000e+00 : f32
    %cst_24 = arith.constant 5.000000e+00 : f32
    %47 = vector.broadcast %cst_23 : f32 to vector<16x16xf32>
    %48 = arith.maximumf %47, %46 : vector<16x16xf32>
    %49 = vector.broadcast %cst_24 : f32 to vector<16x16xf32>
    %50 = arith.minimumf %49, %48 : vector<16x16xf32>
    %51 = math.exp %50 : vector<16x16xf32>
    %52 = arith.mulf %51, %13 : vector<16x16xf32>
    %cst_25 = arith.constant dense<0.000000e+00> : vector<16xf32>
    %53 = vector.multi_reduction <add>, %52, %cst_25 [1] : vector<16x16xf32> to vector<16xf32>
    %54 = vector.shape_cast %53 : vector<16xf32> to vector<16x1xf32>
    %55 = arith.truncf %52 : vector<16x16xf32> to vector<16x16xbf16>
    %56 = vector.extract_strided_slice %39 {offsets = [0, 0], sizes = [16, 8], strides = [1, 1]} : vector<16x32xbf16> to vector<16x8xbf16>
    %cst_26 = arith.constant dense<0.000000e+00> : vector<16x8xf32>
    %57 = tpu.matmul %55, %56, %cst_26 {dimension_numbers = #tpu.dot_dimension_numbers<[1], [0], [0], [1], [0, 0, 1, 1], [], []>} : vector<16x16xbf16>, vector<16x8xbf16>, vector<16x8xf32> -> vector<16x8xf32>
    %cst_27 = arith.constant 9.99999997E-7 : f32
    %58 = vector.broadcast %cst_27 : f32 to vector<16x1xf32>
    %59 = arith.addf %54, %58 : vector<16x1xf32>
    %60 = tpu.reciprocal %59 {approx = true} : vector<16x1xf32> -> vector<16x1xf32>
    %61 = vector.broadcast %60 : vector<16x1xf32> to vector<16x8xf32>
    %62 = arith.mulf %57, %61 : vector<16x8xf32>
    %63 = vector.extract_strided_slice %19 {offsets = [0, 8], sizes = [16, 8], strides = [1, 1]} : vector<16x32xbf16> to vector<16x8xbf16>
    %64 = vector.extract_strided_slice %24 {offsets = [0, 8], sizes = [16, 8], strides = [1, 1]} : vector<16x32xbf16> to vector<16x8xbf16>
    %cst_28 = arith.constant dense<0.000000e+00> : vector<16x16xf32>
    %65 = tpu.matmul %63, %64, %cst_28 {dimension_numbers = #tpu.dot_dimension_numbers<[1], [1], [0], [0], [0, 0, 1, 0], [], []>} : vector<16x8xbf16>, vector<16x8xbf16>, vector<16x16xf32> -> vector<16x16xf32>
    %66 = vector.extract_strided_slice %29 {offsets = [0, 8], sizes = [16, 8], strides = [1, 1]} : vector<16x32xbf16> to vector<16x8xbf16>
    %67 = vector.extract_strided_slice %34 {offsets = [0, 8], sizes = [16, 8], strides = [1, 1]} : vector<16x32xbf16> to vector<16x8xbf16>
    %cst_29 = arith.constant dense<0.000000e+00> : vector<16x16xf32>
    %68 = tpu.matmul %66, %67, %cst_29 {dimension_numbers = #tpu.dot_dimension_numbers<[1], [1], [0], [0], [0, 0, 1, 0], [], []>} : vector<16x8xbf16>, vector<16x8xbf16>, vector<16x16xf32> -> vector<16x16xf32>
    %69 = arith.select %8, %65, %68 : vector<16x16xi1>, vector<16x16xf32>
    %cst_30 = arith.constant -5.000000e+00 : f32
    %cst_31 = arith.constant 5.000000e+00 : f32
    %70 = vector.broadcast %cst_30 : f32 to vector<16x16xf32>
    %71 = arith.maximumf %70, %69 : vector<16x16xf32>
    %72 = vector.broadcast %cst_31 : f32 to vector<16x16xf32>
    %73 = arith.minimumf %72, %71 : vector<16x16xf32>
    %74 = math.exp %73 : vector<16x16xf32>
    %75 = arith.mulf %74, %13 : vector<16x16xf32>
    %cst_32 = arith.constant dense<0.000000e+00> : vector<16xf32>
    %76 = vector.multi_reduction <add>, %75, %cst_32 [1] : vector<16x16xf32> to vector<16xf32>
    %77 = vector.shape_cast %76 : vector<16xf32> to vector<16x1xf32>
    %78 = arith.truncf %75 : vector<16x16xf32> to vector<16x16xbf16>
    %79 = vector.extract_strided_slice %39 {offsets = [0, 8], sizes = [16, 8], strides = [1, 1]} : vector<16x32xbf16> to vector<16x8xbf16>
    %cst_33 = arith.constant dense<0.000000e+00> : vector<16x8xf32>
    %80 = tpu.matmul %78, %79, %cst_33 {dimension_numbers = #tpu.dot_dimension_numbers<[1], [0], [0], [1], [0, 0, 1, 1], [], []>} : vector<16x16xbf16>, vector<16x8xbf16>, vector<16x8xf32> -> vector<16x8xf32>
    %cst_34 = arith.constant 9.99999997E-7 : f32
    %81 = vector.broadcast %cst_34 : f32 to vector<16x1xf32>
    %82 = arith.addf %77, %81 : vector<16x1xf32>
    %83 = tpu.reciprocal %82 {approx = true} : vector<16x1xf32> -> vector<16x1xf32>
    %84 = vector.broadcast %83 : vector<16x1xf32> to vector<16x8xf32>
    %85 = arith.mulf %80, %84 : vector<16x8xf32>
    %86 = vector.extract_strided_slice %19 {offsets = [0, 16], sizes = [16, 8], strides = [1, 1]} : vector<16x32xbf16> to vector<16x8xbf16>
    %87 = vector.extract_strided_slice %24 {offsets = [0, 16], sizes = [16, 8], strides = [1, 1]} : vector<16x32xbf16> to vector<16x8xbf16>
    %cst_35 = arith.constant dense<0.000000e+00> : vector<16x16xf32>
    %88 = tpu.matmul %86, %87, %cst_35 {dimension_numbers = #tpu.dot_dimension_numbers<[1], [1], [0], [0], [0, 0, 1, 0], [], []>} : vector<16x8xbf16>, vector<16x8xbf16>, vector<16x16xf32> -> vector<16x16xf32>
    %89 = vector.extract_strided_slice %29 {offsets = [0, 16], sizes = [16, 8], strides = [1, 1]} : vector<16x32xbf16> to vector<16x8xbf16>
    %90 = vector.extract_strided_slice %34 {offsets = [0, 16], sizes = [16, 8], strides = [1, 1]} : vector<16x32xbf16> to vector<16x8xbf16>
    %cst_36 = arith.constant dense<0.000000e+00> : vector<16x16xf32>
    %91 = tpu.matmul %89, %90, %cst_36 {dimension_numbers = #tpu.dot_dimension_numbers<[1], [1], [0], [0], [0, 0, 1, 0], [], []>} : vector<16x8xbf16>, vector<16x8xbf16>, vector<16x16xf32> -> vector<16x16xf32>
    %92 = arith.select %8, %88, %91 : vector<16x16xi1>, vector<16x16xf32>
    %cst_37 = arith.constant -5.000000e+00 : f32
    %cst_38 = arith.constant 5.000000e+00 : f32
    %93 = vector.broadcast %cst_37 : f32 to vector<16x16xf32>
    %94 = arith.maximumf %93, %92 : vector<16x16xf32>
    %95 = vector.broadcast %cst_38 : f32 to vector<16x16xf32>
    %96 = arith.minimumf %95, %94 : vector<16x16xf32>
    %97 = math.exp %96 : vector<16x16xf32>
    %98 = arith.mulf %97, %13 : vector<16x16xf32>
    %cst_39 = arith.constant dense<0.000000e+00> : vector<16xf32>
    %99 = vector.multi_reduction <add>, %98, %cst_39 [1] : vector<16x16xf32> to vector<16xf32>
    %100 = vector.shape_cast %99 : vector<16xf32> to vector<16x1xf32>
    %101 = arith.truncf %98 : vector<16x16xf32> to vector<16x16xbf16>
    %102 = vector.extract_strided_slice %39 {offsets = [0, 16], sizes = [16, 8], strides = [1, 1]} : vector<16x32xbf16> to vector<16x8xbf16>
    %cst_40 = arith.constant dense<0.000000e+00> : vector<16x8xf32>
    %103 = tpu.matmul %101, %102, %cst_40 {dimension_numbers = #tpu.dot_dimension_numbers<[1], [0], [0], [1], [0, 0, 1, 1], [], []>} : vector<16x16xbf16>, vector<16x8xbf16>, vector<16x8xf32> -> vector<16x8xf32>
    %cst_41 = arith.constant 9.99999997E-7 : f32
    %104 = vector.broadcast %cst_41 : f32 to vector<16x1xf32>
    %105 = arith.addf %100, %104 : vector<16x1xf32>
    %106 = tpu.reciprocal %105 {approx = true} : vector<16x1xf32> -> vector<16x1xf32>
    %107 = vector.broadcast %106 : vector<16x1xf32> to vector<16x8xf32>
    %108 = arith.mulf %103, %107 : vector<16x8xf32>
    %109 = vector.extract_strided_slice %19 {offsets = [0, 24], sizes = [16, 8], strides = [1, 1]} : vector<16x32xbf16> to vector<16x8xbf16>
    %110 = vector.extract_strided_slice %24 {offsets = [0, 24], sizes = [16, 8], strides = [1, 1]} : vector<16x32xbf16> to vector<16x8xbf16>
    %cst_42 = arith.constant dense<0.000000e+00> : vector<16x16xf32>
    %111 = tpu.matmul %109, %110, %cst_42 {dimension_numbers = #tpu.dot_dimension_numbers<[1], [1], [0], [0], [0, 0, 1, 0], [], []>} : vector<16x8xbf16>, vector<16x8xbf16>, vector<16x16xf32> -> vector<16x16xf32>
    %112 = vector.extract_strided_slice %29 {offsets = [0, 24], sizes = [16, 8], strides = [1, 1]} : vector<16x32xbf16> to vector<16x8xbf16>
    %113 = vector.extract_strided_slice %34 {offsets = [0, 24], sizes = [16, 8], strides = [1, 1]} : vector<16x32xbf16> to vector<16x8xbf16>
    %cst_43 = arith.constant dense<0.000000e+00> : vector<16x16xf32>
    %114 = tpu.matmul %112, %113, %cst_43 {dimension_numbers = #tpu.dot_dimension_numbers<[1], [1], [0], [0], [0, 0, 1, 0], [], []>} : vector<16x8xbf16>, vector<16x8xbf16>, vector<16x16xf32> -> vector<16x16xf32>
    %115 = arith.select %8, %111, %114 : vector<16x16xi1>, vector<16x16xf32>
    %cst_44 = arith.constant -5.000000e+00 : f32
    %cst_45 = arith.constant 5.000000e+00 : f32
    %116 = vector.broadcast %cst_44 : f32 to vector<16x16xf32>
    %117 = arith.maximumf %116, %115 : vector<16x16xf32>
    %118 = vector.broadcast %cst_45 : f32 to vector<16x16xf32>
    %119 = arith.minimumf %118, %117 : vector<16x16xf32>
    %120 = math.exp %119 : vector<16x16xf32>
    %121 = arith.mulf %120, %13 : vector<16x16xf32>
    %cst_46 = arith.constant dense<0.000000e+00> : vector<16xf32>
    %122 = vector.multi_reduction <add>, %121, %cst_46 [1] : vector<16x16xf32> to vector<16xf32>
    %123 = vector.shape_cast %122 : vector<16xf32> to vector<16x1xf32>
    %124 = arith.truncf %121 : vector<16x16xf32> to vector<16x16xbf16>
    %125 = vector.extract_strided_slice %39 {offsets = [0, 24], sizes = [16, 8], strides = [1, 1]} : vector<16x32xbf16> to vector<16x8xbf16>
    %cst_47 = arith.constant dense<0.000000e+00> : vector<16x8xf32>
    %126 = tpu.matmul %124, %125, %cst_47 {dimension_numbers = #tpu.dot_dimension_numbers<[1], [0], [0], [1], [0, 0, 1, 1], [], []>} : vector<16x16xbf16>, vector<16x8xbf16>, vector<16x8xf32> -> vector<16x8xf32>
    %cst_48 = arith.constant 9.99999997E-7 : f32
    %127 = vector.broadcast %cst_48 : f32 to vector<16x1xf32>
    %128 = arith.addf %123, %127 : vector<16x1xf32>
    %129 = tpu.reciprocal %128 {approx = true} : vector<16x1xf32> -> vector<16x1xf32>
    %130 = vector.broadcast %129 : vector<16x1xf32> to vector<16x8xf32>
    %131 = arith.mulf %126, %130 : vector<16x8xf32>
    %132 = tpu.concatenate %62, %85, %108, %131 in 1 : vector<16x8xf32>, vector<16x8xf32>, vector<16x8xf32>, vector<16x8xf32> -> vector<16x32xf32>
    %133 = arith.truncf %132 : vector<16x32xf32> to vector<16x32xbf16>
    %134 = arith.index_cast %c0_i32_5 : i32 to index
    %c0_49 = arith.constant 0 : index
    %c0_50 = arith.constant 0 : index
    %135 = vector.load %arg7[%134, %c0_49, %c0_50] : memref<2x32x32xbf16, #tpu.memory_space<vmem>>, vector<1x32x32xbf16>
    %136 = vector.shape_cast %135 : vector<1x32x32xbf16> to vector<32x32xbf16>
    %cst_51 = arith.constant dense<0.000000e+00> : vector<16x32xf32>
    %137 = tpu.matmul %133, %136, %cst_51 {dimension_numbers = #tpu.dot_dimension_numbers<[1], [0], [0], [1], [0, 0, 1, 1], [], []>} : vector<16x32xbf16>, vector<32x32xbf16>, vector<16x32xf32> -> vector<16x32xf32>
    %138 = arith.addf %0, %137 : vector<16x32xf32>
    %139 = arith.index_cast %c0_i32_5 : i32 to index
    %c0_52 = arith.constant 0 : index
    %c0_53 = arith.constant 0 : index
    %140 = vector.load %arg8[%139, %c0_52, %c0_53] : memref<2x1x32xf32, #tpu.memory_space<vmem>>, vector<1x1x32xf32>
    %141 = vector.shape_cast %140 : vector<1x1x32xf32> to vector<1x32xf32>
    %142 = vector.broadcast %141 : vector<1x32xf32> to vector<16x32xf32>
    %143 = arith.addf %138, %142 : vector<16x32xf32>
    %cst_54 = arith.constant dense<0.000000e+00> : vector<16xf32>
    %144 = vector.multi_reduction <add>, %143, %cst_54 [1] : vector<16x32xf32> to vector<16xf32>
    %145 = vector.shape_cast %144 : vector<16xf32> to vector<16x1xf32>
    %cst_55 = arith.constant 3.200000e+01 : f32
    %146 = vector.broadcast %cst_55 : f32 to vector<16x1xf32>
    %147 = arith.divf %145, %146 : vector<16x1xf32>
    %148 = vector.broadcast %147 : vector<16x1xf32> to vector<16x32xf32>
    %149 = arith.subf %143, %148 : vector<16x32xf32>
    %150 = arith.mulf %149, %149 : vector<16x32xf32>
    %cst_56 = arith.constant dense<0.000000e+00> : vector<16xf32>
    %151 = vector.multi_reduction <add>, %150, %cst_56 [1] : vector<16x32xf32> to vector<16xf32>
    %152 = vector.shape_cast %151 : vector<16xf32> to vector<16x1xf32>
    %cst_57 = arith.constant 3.200000e+01 : f32
    %153 = vector.broadcast %cst_57 : f32 to vector<16x1xf32>
    %154 = arith.divf %152, %153 : vector<16x1xf32>
    %155 = vector.broadcast %147 : vector<16x1xf32> to vector<16x32xf32>
    %156 = arith.subf %143, %155 : vector<16x32xf32>
    %cst_58 = arith.constant 9.99999974E-6 : f32
    %157 = vector.broadcast %cst_58 : f32 to vector<16x1xf32>
    %158 = arith.addf %154, %157 : vector<16x1xf32>
    %159 = math.rsqrt %158 : vector<16x1xf32>
    %160 = vector.broadcast %159 : vector<16x1xf32> to vector<16x32xf32>
    %161 = arith.mulf %156, %160 : vector<16x32xf32>
    %162 = arith.index_cast %c0_i32_5 : i32 to index
    %c0_59 = arith.constant 0 : index
    %c0_60 = arith.constant 0 : index
    %163 = vector.load %arg9[%162, %c0_59, %c0_60] : memref<2x1x32xf32, #tpu.memory_space<vmem>>, vector<1x1x32xf32>
    %164 = vector.shape_cast %163 : vector<1x1x32xf32> to vector<1x32xf32>
    %165 = vector.broadcast %164 : vector<1x32xf32> to vector<16x32xf32>
    %166 = arith.mulf %161, %165 : vector<16x32xf32>
    %167 = arith.index_cast %c0_i32_5 : i32 to index
    %c0_61 = arith.constant 0 : index
    %c0_62 = arith.constant 0 : index
    %168 = vector.load %arg10[%167, %c0_61, %c0_62] : memref<2x1x32xf32, #tpu.memory_space<vmem>>, vector<1x1x32xf32>
    %169 = vector.shape_cast %168 : vector<1x1x32xf32> to vector<1x32xf32>
    %170 = vector.broadcast %169 : vector<1x32xf32> to vector<16x32xf32>
    %171 = arith.addf %166, %170 : vector<16x32xf32>
    %172 = arith.truncf %171 : vector<16x32xf32> to vector<16x32xbf16>
    %173 = arith.index_cast %c0_i32_5 : i32 to index
    %c0_63 = arith.constant 0 : index
    %c0_64 = arith.constant 0 : index
    %174 = vector.load %arg11[%173, %c0_63, %c0_64] : memref<2x32x64xbf16, #tpu.memory_space<vmem>>, vector<1x32x64xbf16>
    %175 = vector.shape_cast %174 : vector<1x32x64xbf16> to vector<32x64xbf16>
    %cst_65 = arith.constant dense<0.000000e+00> : vector<16x64xf32>
    %176 = tpu.matmul %172, %175, %cst_65 {dimension_numbers = #tpu.dot_dimension_numbers<[1], [0], [0], [1], [0, 0, 1, 1], [], []>} : vector<16x32xbf16>, vector<32x64xbf16>, vector<16x64xf32> -> vector<16x64xf32>
    %177 = arith.index_cast %c0_i32_5 : i32 to index
    %c0_66 = arith.constant 0 : index
    %c0_67 = arith.constant 0 : index
    %178 = vector.load %arg12[%177, %c0_66, %c0_67] : memref<2x1x64xf32, #tpu.memory_space<vmem>>, vector<1x1x64xf32>
    %179 = vector.shape_cast %178 : vector<1x1x64xf32> to vector<1x64xf32>
    %180 = vector.broadcast %179 : vector<1x64xf32> to vector<16x64xf32>
    %181 = arith.addf %176, %180 : vector<16x64xf32>
    %cst_68 = arith.constant 0.000000e+00 : f32
    %182 = vector.broadcast %cst_68 : f32 to vector<16x64xf32>
    %183 = arith.maximumf %181, %182 : vector<16x64xf32>
    %184 = arith.truncf %183 : vector<16x64xf32> to vector<16x64xbf16>
    %185 = arith.index_cast %c0_i32_5 : i32 to index
    %c0_69 = arith.constant 0 : index
    %c0_70 = arith.constant 0 : index
    %186 = vector.load %arg13[%185, %c0_69, %c0_70] : memref<2x64x32xbf16, #tpu.memory_space<vmem>>, vector<1x64x32xbf16>
    %187 = vector.shape_cast %186 : vector<1x64x32xbf16> to vector<64x32xbf16>
    %cst_71 = arith.constant dense<0.000000e+00> : vector<16x32xf32>
    %188 = tpu.matmul %184, %187, %cst_71 {dimension_numbers = #tpu.dot_dimension_numbers<[1], [0], [0], [1], [0, 0, 1, 1], [], []>} : vector<16x64xbf16>, vector<64x32xbf16>, vector<16x32xf32> -> vector<16x32xf32>
    %189 = arith.index_cast %c0_i32_5 : i32 to index
    %c0_72 = arith.constant 0 : index
    %c0_73 = arith.constant 0 : index
    %190 = vector.load %arg14[%189, %c0_72, %c0_73] : memref<2x1x32xf32, #tpu.memory_space<vmem>>, vector<1x1x32xf32>
    %191 = vector.shape_cast %190 : vector<1x1x32xf32> to vector<1x32xf32>
    %192 = vector.broadcast %191 : vector<1x32xf32> to vector<16x32xf32>
    %193 = arith.addf %188, %192 : vector<16x32xf32>
    %194 = arith.addf %171, %193 : vector<16x32xf32>
    %cst_74 = arith.constant dense<0.000000e+00> : vector<16xf32>
    %195 = vector.multi_reduction <add>, %194, %cst_74 [1] : vector<16x32xf32> to vector<16xf32>
    %196 = vector.shape_cast %195 : vector<16xf32> to vector<16x1xf32>
    %cst_75 = arith.constant 3.200000e+01 : f32
    %197 = vector.broadcast %cst_75 : f32 to vector<16x1xf32>
    %198 = arith.divf %196, %197 : vector<16x1xf32>
    %199 = vector.broadcast %198 : vector<16x1xf32> to vector<16x32xf32>
    %200 = arith.subf %194, %199 : vector<16x32xf32>
    %201 = arith.mulf %200, %200 : vector<16x32xf32>
    %cst_76 = arith.constant dense<0.000000e+00> : vector<16xf32>
    %202 = vector.multi_reduction <add>, %201, %cst_76 [1] : vector<16x32xf32> to vector<16xf32>
    %203 = vector.shape_cast %202 : vector<16xf32> to vector<16x1xf32>
    %cst_77 = arith.constant 3.200000e+01 : f32
    %204 = vector.broadcast %cst_77 : f32 to vector<16x1xf32>
    %205 = arith.divf %203, %204 : vector<16x1xf32>
    %206 = vector.broadcast %198 : vector<16x1xf32> to vector<16x32xf32>
    %207 = arith.subf %194, %206 : vector<16x32xf32>
    %cst_78 = arith.constant 9.99999974E-6 : f32
    %208 = vector.broadcast %cst_78 : f32 to vector<16x1xf32>
    %209 = arith.addf %205, %208 : vector<16x1xf32>
    %210 = math.rsqrt %209 : vector<16x1xf32>
    %211 = vector.broadcast %210 : vector<16x1xf32> to vector<16x32xf32>
    %212 = arith.mulf %207, %211 : vector<16x32xf32>
    %213 = arith.index_cast %c0_i32_5 : i32 to index
    %c0_79 = arith.constant 0 : index
    %c0_80 = arith.constant 0 : index
    %214 = vector.load %arg15[%213, %c0_79, %c0_80] : memref<2x1x32xf32, #tpu.memory_space<vmem>>, vector<1x1x32xf32>
    %215 = vector.shape_cast %214 : vector<1x1x32xf32> to vector<1x32xf32>
    %216 = vector.broadcast %215 : vector<1x32xf32> to vector<16x32xf32>
    %217 = arith.mulf %212, %216 : vector<16x32xf32>
    %218 = arith.index_cast %c0_i32_5 : i32 to index
    %c0_81 = arith.constant 0 : index
    %c0_82 = arith.constant 0 : index
    %219 = vector.load %arg16[%218, %c0_81, %c0_82] : memref<2x1x32xf32, #tpu.memory_space<vmem>>, vector<1x1x32xf32>
    %220 = vector.shape_cast %219 : vector<1x1x32xf32> to vector<1x32xf32>
    %221 = vector.broadcast %220 : vector<1x32xf32> to vector<16x32xf32>
    %222 = arith.addf %217, %221 : vector<16x32xf32>
    %c1_i32 = arith.constant 1 : i32
    %223 = arith.truncf %222 : vector<16x32xf32> to vector<16x32xbf16>
    %224 = arith.index_cast %c1_i32 : i32 to index
    %c0_83 = arith.constant 0 : index
    %c0_84 = arith.constant 0 : index
    %225 = vector.load %arg2[%224, %c0_83, %c0_84] : memref<2x32x32xbf16, #tpu.memory_space<vmem>>, vector<1x32x32xbf16>
    %226 = vector.shape_cast %225 : vector<1x32x32xbf16> to vector<32x32xbf16>
    %cst_85 = arith.constant dense<0.000000e+00> : vector<16x32xf32>
    %227 = tpu.matmul %223, %226, %cst_85 {dimension_numbers = #tpu.dot_dimension_numbers<[1], [0], [0], [1], [0, 0, 1, 1], [], []>} : vector<16x32xbf16>, vector<32x32xbf16>, vector<16x32xf32> -> vector<16x32xf32>
    %228 = arith.truncf %227 : vector<16x32xf32> to vector<16x32xbf16>
    %229 = arith.index_cast %c1_i32 : i32 to index
    %c0_86 = arith.constant 0 : index
    %c0_87 = arith.constant 0 : index
    %230 = vector.load %arg3[%229, %c0_86, %c0_87] : memref<2x32x32xbf16, #tpu.memory_space<vmem>>, vector<1x32x32xbf16>
    %231 = vector.shape_cast %230 : vector<1x32x32xbf16> to vector<32x32xbf16>
    %cst_88 = arith.constant dense<0.000000e+00> : vector<16x32xf32>
    %232 = tpu.matmul %223, %231, %cst_88 {dimension_numbers = #tpu.dot_dimension_numbers<[1], [0], [0], [1], [0, 0, 1, 1], [], []>} : vector<16x32xbf16>, vector<32x32xbf16>, vector<16x32xf32> -> vector<16x32xf32>
    %233 = arith.truncf %232 : vector<16x32xf32> to vector<16x32xbf16>
    %234 = arith.index_cast %c1_i32 : i32 to index
    %c0_89 = arith.constant 0 : index
    %c0_90 = arith.constant 0 : index
    %235 = vector.load %arg5[%234, %c0_89, %c0_90] : memref<2x32x32xbf16, #tpu.memory_space<vmem>>, vector<1x32x32xbf16>
    %236 = vector.shape_cast %235 : vector<1x32x32xbf16> to vector<32x32xbf16>
    %cst_91 = arith.constant dense<0.000000e+00> : vector<16x32xf32>
    %237 = tpu.matmul %223, %236, %cst_91 {dimension_numbers = #tpu.dot_dimension_numbers<[1], [0], [0], [1], [0, 0, 1, 1], [], []>} : vector<16x32xbf16>, vector<32x32xbf16>, vector<16x32xf32> -> vector<16x32xf32>
    %238 = arith.truncf %237 : vector<16x32xf32> to vector<16x32xbf16>
    %239 = arith.index_cast %c1_i32 : i32 to index
    %c0_92 = arith.constant 0 : index
    %c0_93 = arith.constant 0 : index
    %240 = vector.load %arg6[%239, %c0_92, %c0_93] : memref<2x32x32xbf16, #tpu.memory_space<vmem>>, vector<1x32x32xbf16>
    %241 = vector.shape_cast %240 : vector<1x32x32xbf16> to vector<32x32xbf16>
    %cst_94 = arith.constant dense<0.000000e+00> : vector<16x32xf32>
    %242 = tpu.matmul %223, %241, %cst_94 {dimension_numbers = #tpu.dot_dimension_numbers<[1], [0], [0], [1], [0, 0, 1, 1], [], []>} : vector<16x32xbf16>, vector<32x32xbf16>, vector<16x32xf32> -> vector<16x32xf32>
    %243 = arith.truncf %242 : vector<16x32xf32> to vector<16x32xbf16>
    %244 = arith.index_cast %c1_i32 : i32 to index
    %c0_95 = arith.constant 0 : index
    %c0_96 = arith.constant 0 : index
    %245 = vector.load %arg4[%244, %c0_95, %c0_96] : memref<2x32x32xbf16, #tpu.memory_space<vmem>>, vector<1x32x32xbf16>
    %246 = vector.shape_cast %245 : vector<1x32x32xbf16> to vector<32x32xbf16>
    %cst_97 = arith.constant dense<0.000000e+00> : vector<16x32xf32>
    %247 = tpu.matmul %223, %246, %cst_97 {dimension_numbers = #tpu.dot_dimension_numbers<[1], [0], [0], [1], [0, 0, 1, 1], [], []>} : vector<16x32xbf16>, vector<32x32xbf16>, vector<16x32xf32> -> vector<16x32xf32>
    %248 = arith.truncf %247 : vector<16x32xf32> to vector<16x32xbf16>
    %249 = vector.extract_strided_slice %228 {offsets = [0, 0], sizes = [16, 8], strides = [1, 1]} : vector<16x32xbf16> to vector<16x8xbf16>
    %250 = vector.extract_strided_slice %233 {offsets = [0, 0], sizes = [16, 8], strides = [1, 1]} : vector<16x32xbf16> to vector<16x8xbf16>
    %cst_98 = arith.constant dense<0.000000e+00> : vector<16x16xf32>
    %251 = tpu.matmul %249, %250, %cst_98 {dimension_numbers = #tpu.dot_dimension_numbers<[1], [1], [0], [0], [0, 0, 1, 0], [], []>} : vector<16x8xbf16>, vector<16x8xbf16>, vector<16x16xf32> -> vector<16x16xf32>
    %252 = vector.extract_strided_slice %238 {offsets = [0, 0], sizes = [16, 8], strides = [1, 1]} : vector<16x32xbf16> to vector<16x8xbf16>
    %253 = vector.extract_strided_slice %243 {offsets = [0, 0], sizes = [16, 8], strides = [1, 1]} : vector<16x32xbf16> to vector<16x8xbf16>
    %cst_99 = arith.constant dense<0.000000e+00> : vector<16x16xf32>
    %254 = tpu.matmul %252, %253, %cst_99 {dimension_numbers = #tpu.dot_dimension_numbers<[1], [1], [0], [0], [0, 0, 1, 0], [], []>} : vector<16x8xbf16>, vector<16x8xbf16>, vector<16x16xf32> -> vector<16x16xf32>
    %255 = arith.select %8, %251, %254 : vector<16x16xi1>, vector<16x16xf32>
    %cst_100 = arith.constant -5.000000e+00 : f32
    %cst_101 = arith.constant 5.000000e+00 : f32
    %256 = vector.broadcast %cst_100 : f32 to vector<16x16xf32>
    %257 = arith.maximumf %256, %255 : vector<16x16xf32>
    %258 = vector.broadcast %cst_101 : f32 to vector<16x16xf32>
    %259 = arith.minimumf %258, %257 : vector<16x16xf32>
    %260 = math.exp %259 : vector<16x16xf32>
    %261 = arith.mulf %260, %13 : vector<16x16xf32>
    %cst_102 = arith.constant dense<0.000000e+00> : vector<16xf32>
    %262 = vector.multi_reduction <add>, %261, %cst_102 [1] : vector<16x16xf32> to vector<16xf32>
    %263 = vector.shape_cast %262 : vector<16xf32> to vector<16x1xf32>
    %264 = arith.truncf %261 : vector<16x16xf32> to vector<16x16xbf16>
    %265 = vector.extract_strided_slice %248 {offsets = [0, 0], sizes = [16, 8], strides = [1, 1]} : vector<16x32xbf16> to vector<16x8xbf16>
    %cst_103 = arith.constant dense<0.000000e+00> : vector<16x8xf32>
    %266 = tpu.matmul %264, %265, %cst_103 {dimension_numbers = #tpu.dot_dimension_numbers<[1], [0], [0], [1], [0, 0, 1, 1], [], []>} : vector<16x16xbf16>, vector<16x8xbf16>, vector<16x8xf32> -> vector<16x8xf32>
    %cst_104 = arith.constant 9.99999997E-7 : f32
    %267 = vector.broadcast %cst_104 : f32 to vector<16x1xf32>
    %268 = arith.addf %263, %267 : vector<16x1xf32>
    %269 = tpu.reciprocal %268 {approx = true} : vector<16x1xf32> -> vector<16x1xf32>
    %270 = vector.broadcast %269 : vector<16x1xf32> to vector<16x8xf32>
    %271 = arith.mulf %266, %270 : vector<16x8xf32>
    %272 = vector.extract_strided_slice %228 {offsets = [0, 8], sizes = [16, 8], strides = [1, 1]} : vector<16x32xbf16> to vector<16x8xbf16>
    %273 = vector.extract_strided_slice %233 {offsets = [0, 8], sizes = [16, 8], strides = [1, 1]} : vector<16x32xbf16> to vector<16x8xbf16>
    %cst_105 = arith.constant dense<0.000000e+00> : vector<16x16xf32>
    %274 = tpu.matmul %272, %273, %cst_105 {dimension_numbers = #tpu.dot_dimension_numbers<[1], [1], [0], [0], [0, 0, 1, 0], [], []>} : vector<16x8xbf16>, vector<16x8xbf16>, vector<16x16xf32> -> vector<16x16xf32>
    %275 = vector.extract_strided_slice %238 {offsets = [0, 8], sizes = [16, 8], strides = [1, 1]} : vector<16x32xbf16> to vector<16x8xbf16>
    %276 = vector.extract_strided_slice %243 {offsets = [0, 8], sizes = [16, 8], strides = [1, 1]} : vector<16x32xbf16> to vector<16x8xbf16>
    %cst_106 = arith.constant dense<0.000000e+00> : vector<16x16xf32>
    %277 = tpu.matmul %275, %276, %cst_106 {dimension_numbers = #tpu.dot_dimension_numbers<[1], [1], [0], [0], [0, 0, 1, 0], [], []>} : vector<16x8xbf16>, vector<16x8xbf16>, vector<16x16xf32> -> vector<16x16xf32>
    %278 = arith.select %8, %274, %277 : vector<16x16xi1>, vector<16x16xf32>
    %cst_107 = arith.constant -5.000000e+00 : f32
    %cst_108 = arith.constant 5.000000e+00 : f32
    %279 = vector.broadcast %cst_107 : f32 to vector<16x16xf32>
    %280 = arith.maximumf %279, %278 : vector<16x16xf32>
    %281 = vector.broadcast %cst_108 : f32 to vector<16x16xf32>
    %282 = arith.minimumf %281, %280 : vector<16x16xf32>
    %283 = math.exp %282 : vector<16x16xf32>
    %284 = arith.mulf %283, %13 : vector<16x16xf32>
    %cst_109 = arith.constant dense<0.000000e+00> : vector<16xf32>
    %285 = vector.multi_reduction <add>, %284, %cst_109 [1] : vector<16x16xf32> to vector<16xf32>
    %286 = vector.shape_cast %285 : vector<16xf32> to vector<16x1xf32>
    %287 = arith.truncf %284 : vector<16x16xf32> to vector<16x16xbf16>
    %288 = vector.extract_strided_slice %248 {offsets = [0, 8], sizes = [16, 8], strides = [1, 1]} : vector<16x32xbf16> to vector<16x8xbf16>
    %cst_110 = arith.constant dense<0.000000e+00> : vector<16x8xf32>
    %289 = tpu.matmul %287, %288, %cst_110 {dimension_numbers = #tpu.dot_dimension_numbers<[1], [0], [0], [1], [0, 0, 1, 1], [], []>} : vector<16x16xbf16>, vector<16x8xbf16>, vector<16x8xf32> -> vector<16x8xf32>
    %cst_111 = arith.constant 9.99999997E-7 : f32
    %290 = vector.broadcast %cst_111 : f32 to vector<16x1xf32>
    %291 = arith.addf %286, %290 : vector<16x1xf32>
    %292 = tpu.reciprocal %291 {approx = true} : vector<16x1xf32> -> vector<16x1xf32>
    %293 = vector.broadcast %292 : vector<16x1xf32> to vector<16x8xf32>
    %294 = arith.mulf %289, %293 : vector<16x8xf32>
    %295 = vector.extract_strided_slice %228 {offsets = [0, 16], sizes = [16, 8], strides = [1, 1]} : vector<16x32xbf16> to vector<16x8xbf16>
    %296 = vector.extract_strided_slice %233 {offsets = [0, 16], sizes = [16, 8], strides = [1, 1]} : vector<16x32xbf16> to vector<16x8xbf16>
    %cst_112 = arith.constant dense<0.000000e+00> : vector<16x16xf32>
    %297 = tpu.matmul %295, %296, %cst_112 {dimension_numbers = #tpu.dot_dimension_numbers<[1], [1], [0], [0], [0, 0, 1, 0], [], []>} : vector<16x8xbf16>, vector<16x8xbf16>, vector<16x16xf32> -> vector<16x16xf32>
    %298 = vector.extract_strided_slice %238 {offsets = [0, 16], sizes = [16, 8], strides = [1, 1]} : vector<16x32xbf16> to vector<16x8xbf16>
    %299 = vector.extract_strided_slice %243 {offsets = [0, 16], sizes = [16, 8], strides = [1, 1]} : vector<16x32xbf16> to vector<16x8xbf16>
    %cst_113 = arith.constant dense<0.000000e+00> : vector<16x16xf32>
    %300 = tpu.matmul %298, %299, %cst_113 {dimension_numbers = #tpu.dot_dimension_numbers<[1], [1], [0], [0], [0, 0, 1, 0], [], []>} : vector<16x8xbf16>, vector<16x8xbf16>, vector<16x16xf32> -> vector<16x16xf32>
    %301 = arith.select %8, %297, %300 : vector<16x16xi1>, vector<16x16xf32>
    %cst_114 = arith.constant -5.000000e+00 : f32
    %cst_115 = arith.constant 5.000000e+00 : f32
    %302 = vector.broadcast %cst_114 : f32 to vector<16x16xf32>
    %303 = arith.maximumf %302, %301 : vector<16x16xf32>
    %304 = vector.broadcast %cst_115 : f32 to vector<16x16xf32>
    %305 = arith.minimumf %304, %303 : vector<16x16xf32>
    %306 = math.exp %305 : vector<16x16xf32>
    %307 = arith.mulf %306, %13 : vector<16x16xf32>
    %cst_116 = arith.constant dense<0.000000e+00> : vector<16xf32>
    %308 = vector.multi_reduction <add>, %307, %cst_116 [1] : vector<16x16xf32> to vector<16xf32>
    %309 = vector.shape_cast %308 : vector<16xf32> to vector<16x1xf32>
    %310 = arith.truncf %307 : vector<16x16xf32> to vector<16x16xbf16>
    %311 = vector.extract_strided_slice %248 {offsets = [0, 16], sizes = [16, 8], strides = [1, 1]} : vector<16x32xbf16> to vector<16x8xbf16>
    %cst_117 = arith.constant dense<0.000000e+00> : vector<16x8xf32>
    %312 = tpu.matmul %310, %311, %cst_117 {dimension_numbers = #tpu.dot_dimension_numbers<[1], [0], [0], [1], [0, 0, 1, 1], [], []>} : vector<16x16xbf16>, vector<16x8xbf16>, vector<16x8xf32> -> vector<16x8xf32>
    %cst_118 = arith.constant 9.99999997E-7 : f32
    %313 = vector.broadcast %cst_118 : f32 to vector<16x1xf32>
    %314 = arith.addf %309, %313 : vector<16x1xf32>
    %315 = tpu.reciprocal %314 {approx = true} : vector<16x1xf32> -> vector<16x1xf32>
    %316 = vector.broadcast %315 : vector<16x1xf32> to vector<16x8xf32>
    %317 = arith.mulf %312, %316 : vector<16x8xf32>
    %318 = vector.extract_strided_slice %228 {offsets = [0, 24], sizes = [16, 8], strides = [1, 1]} : vector<16x32xbf16> to vector<16x8xbf16>
    %319 = vector.extract_strided_slice %233 {offsets = [0, 24], sizes = [16, 8], strides = [1, 1]} : vector<16x32xbf16> to vector<16x8xbf16>
    %cst_119 = arith.constant dense<0.000000e+00> : vector<16x16xf32>
    %320 = tpu.matmul %318, %319, %cst_119 {dimension_numbers = #tpu.dot_dimension_numbers<[1], [1], [0], [0], [0, 0, 1, 0], [], []>} : vector<16x8xbf16>, vector<16x8xbf16>, vector<16x16xf32> -> vector<16x16xf32>
    %321 = vector.extract_strided_slice %238 {offsets = [0, 24], sizes = [16, 8], strides = [1, 1]} : vector<16x32xbf16> to vector<16x8xbf16>
    %322 = vector.extract_strided_slice %243 {offsets = [0, 24], sizes = [16, 8], strides = [1, 1]} : vector<16x32xbf16> to vector<16x8xbf16>
    %cst_120 = arith.constant dense<0.000000e+00> : vector<16x16xf32>
    %323 = tpu.matmul %321, %322, %cst_120 {dimension_numbers = #tpu.dot_dimension_numbers<[1], [1], [0], [0], [0, 0, 1, 0], [], []>} : vector<16x8xbf16>, vector<16x8xbf16>, vector<16x16xf32> -> vector<16x16xf32>
    %324 = arith.select %8, %320, %323 : vector<16x16xi1>, vector<16x16xf32>
    %cst_121 = arith.constant -5.000000e+00 : f32
    %cst_122 = arith.constant 5.000000e+00 : f32
    %325 = vector.broadcast %cst_121 : f32 to vector<16x16xf32>
    %326 = arith.maximumf %325, %324 : vector<16x16xf32>
    %327 = vector.broadcast %cst_122 : f32 to vector<16x16xf32>
    %328 = arith.minimumf %327, %326 : vector<16x16xf32>
    %329 = math.exp %328 : vector<16x16xf32>
    %330 = arith.mulf %329, %13 : vector<16x16xf32>
    %cst_123 = arith.constant dense<0.000000e+00> : vector<16xf32>
    %331 = vector.multi_reduction <add>, %330, %cst_123 [1] : vector<16x16xf32> to vector<16xf32>
    %332 = vector.shape_cast %331 : vector<16xf32> to vector<16x1xf32>
    %333 = arith.truncf %330 : vector<16x16xf32> to vector<16x16xbf16>
    %334 = vector.extract_strided_slice %248 {offsets = [0, 24], sizes = [16, 8], strides = [1, 1]} : vector<16x32xbf16> to vector<16x8xbf16>
    %cst_124 = arith.constant dense<0.000000e+00> : vector<16x8xf32>
    %335 = tpu.matmul %333, %334, %cst_124 {dimension_numbers = #tpu.dot_dimension_numbers<[1], [0], [0], [1], [0, 0, 1, 1], [], []>} : vector<16x16xbf16>, vector<16x8xbf16>, vector<16x8xf32> -> vector<16x8xf32>
    %cst_125 = arith.constant 9.99999997E-7 : f32
    %336 = vector.broadcast %cst_125 : f32 to vector<16x1xf32>
    %337 = arith.addf %332, %336 : vector<16x1xf32>
    %338 = tpu.reciprocal %337 {approx = true} : vector<16x1xf32> -> vector<16x1xf32>
    %339 = vector.broadcast %338 : vector<16x1xf32> to vector<16x8xf32>
    %340 = arith.mulf %335, %339 : vector<16x8xf32>
    %341 = tpu.concatenate %271, %294, %317, %340 in 1 : vector<16x8xf32>, vector<16x8xf32>, vector<16x8xf32>, vector<16x8xf32> -> vector<16x32xf32>
    %342 = arith.truncf %341 : vector<16x32xf32> to vector<16x32xbf16>
    %343 = arith.index_cast %c1_i32 : i32 to index
    %c0_126 = arith.constant 0 : index
    %c0_127 = arith.constant 0 : index
    %344 = vector.load %arg7[%343, %c0_126, %c0_127] : memref<2x32x32xbf16, #tpu.memory_space<vmem>>, vector<1x32x32xbf16>
    %345 = vector.shape_cast %344 : vector<1x32x32xbf16> to vector<32x32xbf16>
    %cst_128 = arith.constant dense<0.000000e+00> : vector<16x32xf32>
    %346 = tpu.matmul %342, %345, %cst_128 {dimension_numbers = #tpu.dot_dimension_numbers<[1], [0], [0], [1], [0, 0, 1, 1], [], []>} : vector<16x32xbf16>, vector<32x32xbf16>, vector<16x32xf32> -> vector<16x32xf32>
    %347 = arith.addf %222, %346 : vector<16x32xf32>
    %348 = arith.index_cast %c1_i32 : i32 to index
    %c0_129 = arith.constant 0 : index
    %c0_130 = arith.constant 0 : index
    %349 = vector.load %arg8[%348, %c0_129, %c0_130] : memref<2x1x32xf32, #tpu.memory_space<vmem>>, vector<1x1x32xf32>
    %350 = vector.shape_cast %349 : vector<1x1x32xf32> to vector<1x32xf32>
    %351 = vector.broadcast %350 : vector<1x32xf32> to vector<16x32xf32>
    %352 = arith.addf %347, %351 : vector<16x32xf32>
    %cst_131 = arith.constant dense<0.000000e+00> : vector<16xf32>
    %353 = vector.multi_reduction <add>, %352, %cst_131 [1] : vector<16x32xf32> to vector<16xf32>
    %354 = vector.shape_cast %353 : vector<16xf32> to vector<16x1xf32>
    %cst_132 = arith.constant 3.200000e+01 : f32
    %355 = vector.broadcast %cst_132 : f32 to vector<16x1xf32>
    %356 = arith.divf %354, %355 : vector<16x1xf32>
    %357 = vector.broadcast %356 : vector<16x1xf32> to vector<16x32xf32>
    %358 = arith.subf %352, %357 : vector<16x32xf32>
    %359 = arith.mulf %358, %358 : vector<16x32xf32>
    %cst_133 = arith.constant dense<0.000000e+00> : vector<16xf32>
    %360 = vector.multi_reduction <add>, %359, %cst_133 [1] : vector<16x32xf32> to vector<16xf32>
    %361 = vector.shape_cast %360 : vector<16xf32> to vector<16x1xf32>
    %cst_134 = arith.constant 3.200000e+01 : f32
    %362 = vector.broadcast %cst_134 : f32 to vector<16x1xf32>
    %363 = arith.divf %361, %362 : vector<16x1xf32>
    %364 = vector.broadcast %356 : vector<16x1xf32> to vector<16x32xf32>
    %365 = arith.subf %352, %364 : vector<16x32xf32>
    %cst_135 = arith.constant 9.99999974E-6 : f32
    %366 = vector.broadcast %cst_135 : f32 to vector<16x1xf32>
    %367 = arith.addf %363, %366 : vector<16x1xf32>
    %368 = math.rsqrt %367 : vector<16x1xf32>
    %369 = vector.broadcast %368 : vector<16x1xf32> to vector<16x32xf32>
    %370 = arith.mulf %365, %369 : vector<16x32xf32>
    %371 = arith.index_cast %c1_i32 : i32 to index
    %c0_136 = arith.constant 0 : index
    %c0_137 = arith.constant 0 : index
    %372 = vector.load %arg9[%371, %c0_136, %c0_137] : memref<2x1x32xf32, #tpu.memory_space<vmem>>, vector<1x1x32xf32>
    %373 = vector.shape_cast %372 : vector<1x1x32xf32> to vector<1x32xf32>
    %374 = vector.broadcast %373 : vector<1x32xf32> to vector<16x32xf32>
    %375 = arith.mulf %370, %374 : vector<16x32xf32>
    %376 = arith.index_cast %c1_i32 : i32 to index
    %c0_138 = arith.constant 0 : index
    %c0_139 = arith.constant 0 : index
    %377 = vector.load %arg10[%376, %c0_138, %c0_139] : memref<2x1x32xf32, #tpu.memory_space<vmem>>, vector<1x1x32xf32>
    %378 = vector.shape_cast %377 : vector<1x1x32xf32> to vector<1x32xf32>
    %379 = vector.broadcast %378 : vector<1x32xf32> to vector<16x32xf32>
    %380 = arith.addf %375, %379 : vector<16x32xf32>
    %381 = arith.truncf %380 : vector<16x32xf32> to vector<16x32xbf16>
    %382 = arith.index_cast %c1_i32 : i32 to index
    %c0_140 = arith.constant 0 : index
    %c0_141 = arith.constant 0 : index
    %383 = vector.load %arg11[%382, %c0_140, %c0_141] : memref<2x32x64xbf16, #tpu.memory_space<vmem>>, vector<1x32x64xbf16>
    %384 = vector.shape_cast %383 : vector<1x32x64xbf16> to vector<32x64xbf16>
    %cst_142 = arith.constant dense<0.000000e+00> : vector<16x64xf32>
    %385 = tpu.matmul %381, %384, %cst_142 {dimension_numbers = #tpu.dot_dimension_numbers<[1], [0], [0], [1], [0, 0, 1, 1], [], []>} : vector<16x32xbf16>, vector<32x64xbf16>, vector<16x64xf32> -> vector<16x64xf32>
    %386 = arith.index_cast %c1_i32 : i32 to index
    %c0_143 = arith.constant 0 : index
    %c0_144 = arith.constant 0 : index
    %387 = vector.load %arg12[%386, %c0_143, %c0_144] : memref<2x1x64xf32, #tpu.memory_space<vmem>>, vector<1x1x64xf32>
    %388 = vector.shape_cast %387 : vector<1x1x64xf32> to vector<1x64xf32>
    %389 = vector.broadcast %388 : vector<1x64xf32> to vector<16x64xf32>
    %390 = arith.addf %385, %389 : vector<16x64xf32>
    %cst_145 = arith.constant 0.000000e+00 : f32
    %391 = vector.broadcast %cst_145 : f32 to vector<16x64xf32>
    %392 = arith.maximumf %390, %391 : vector<16x64xf32>
    %393 = arith.truncf %392 : vector<16x64xf32> to vector<16x64xbf16>
    %394 = arith.index_cast %c1_i32 : i32 to index
    %c0_146 = arith.constant 0 : index
    %c0_147 = arith.constant 0 : index
    %395 = vector.load %arg13[%394, %c0_146, %c0_147] : memref<2x64x32xbf16, #tpu.memory_space<vmem>>, vector<1x64x32xbf16>
    %396 = vector.shape_cast %395 : vector<1x64x32xbf16> to vector<64x32xbf16>
    %cst_148 = arith.constant dense<0.000000e+00> : vector<16x32xf32>
    %397 = tpu.matmul %393, %396, %cst_148 {dimension_numbers = #tpu.dot_dimension_numbers<[1], [0], [0], [1], [0, 0, 1, 1], [], []>} : vector<16x64xbf16>, vector<64x32xbf16>, vector<16x32xf32> -> vector<16x32xf32>
    %398 = arith.index_cast %c1_i32 : i32 to index
    %c0_149 = arith.constant 0 : index
    %c0_150 = arith.constant 0 : index
    %399 = vector.load %arg14[%398, %c0_149, %c0_150] : memref<2x1x32xf32, #tpu.memory_space<vmem>>, vector<1x1x32xf32>
    %400 = vector.shape_cast %399 : vector<1x1x32xf32> to vector<1x32xf32>
    %401 = vector.broadcast %400 : vector<1x32xf32> to vector<16x32xf32>
    %402 = arith.addf %397, %401 : vector<16x32xf32>
    %403 = arith.addf %380, %402 : vector<16x32xf32>
    %cst_151 = arith.constant dense<0.000000e+00> : vector<16xf32>
    %404 = vector.multi_reduction <add>, %403, %cst_151 [1] : vector<16x32xf32> to vector<16xf32>
    %405 = vector.shape_cast %404 : vector<16xf32> to vector<16x1xf32>
    %cst_152 = arith.constant 3.200000e+01 : f32
    %406 = vector.broadcast %cst_152 : f32 to vector<16x1xf32>
    %407 = arith.divf %405, %406 : vector<16x1xf32>
    %408 = vector.broadcast %407 : vector<16x1xf32> to vector<16x32xf32>
    %409 = arith.subf %403, %408 : vector<16x32xf32>
    %410 = arith.mulf %409, %409 : vector<16x32xf32>
    %cst_153 = arith.constant dense<0.000000e+00> : vector<16xf32>
    %411 = vector.multi_reduction <add>, %410, %cst_153 [1] : vector<16x32xf32> to vector<16xf32>
    %412 = vector.shape_cast %411 : vector<16xf32> to vector<16x1xf32>
    %cst_154 = arith.constant 3.200000e+01 : f32
    %413 = vector.broadcast %cst_154 : f32 to vector<16x1xf32>
    %414 = arith.divf %412, %413 : vector<16x1xf32>
    %415 = vector.broadcast %407 : vector<16x1xf32> to vector<16x32xf32>
    %416 = arith.subf %403, %415 : vector<16x32xf32>
    %cst_155 = arith.constant 9.99999974E-6 : f32
    %417 = vector.broadcast %cst_155 : f32 to vector<16x1xf32>
    %418 = arith.addf %414, %417 : vector<16x1xf32>
    %419 = math.rsqrt %418 : vector<16x1xf32>
    %420 = vector.broadcast %419 : vector<16x1xf32> to vector<16x32xf32>
    %421 = arith.mulf %416, %420 : vector<16x32xf32>
    %422 = arith.index_cast %c1_i32 : i32 to index
    %c0_156 = arith.constant 0 : index
    %c0_157 = arith.constant 0 : index
    %423 = vector.load %arg15[%422, %c0_156, %c0_157] : memref<2x1x32xf32, #tpu.memory_space<vmem>>, vector<1x1x32xf32>
    %424 = vector.shape_cast %423 : vector<1x1x32xf32> to vector<1x32xf32>
    %425 = vector.broadcast %424 : vector<1x32xf32> to vector<16x32xf32>
    %426 = arith.mulf %421, %425 : vector<16x32xf32>
    %427 = arith.index_cast %c1_i32 : i32 to index
    %c0_158 = arith.constant 0 : index
    %c0_159 = arith.constant 0 : index
    %428 = vector.load %arg16[%427, %c0_158, %c0_159] : memref<2x1x32xf32, #tpu.memory_space<vmem>>, vector<1x1x32xf32>
    %429 = vector.shape_cast %428 : vector<1x1x32xf32> to vector<1x32xf32>
    %430 = vector.broadcast %429 : vector<1x32xf32> to vector<16x32xf32>
    %431 = arith.addf %426, %430 : vector<16x32xf32>
    %c2_i32 = arith.constant 2 : i32
    %432 = arith.truncf %431 : vector<16x32xf32> to vector<16x32xbf16>
    %c0_160 = arith.constant 0 : index
    %c0_161 = arith.constant 0 : index
    %433 = vector.load %arg17[%c0_160, %c0_161] : memref<32x16xbf16, #tpu.memory_space<vmem>>, vector<32x16xbf16>
    %cst_162 = arith.constant dense<0.000000e+00> : vector<16x16xf32>
    %434 = tpu.matmul %432, %433, %cst_162 {dimension_numbers = #tpu.dot_dimension_numbers<[1], [0], [0], [1], [0, 0, 1, 1], [], []>} : vector<16x32xbf16>, vector<32x16xbf16>, vector<16x16xf32> -> vector<16x16xf32>
    %c0_163 = arith.constant 0 : index
    %c0_164 = arith.constant 0 : index
    %435 = vector.load %arg18[%c0_163, %c0_164] : memref<1x16xf32, #tpu.memory_space<vmem>>, vector<1x16xf32>
    %436 = vector.broadcast %435 : vector<1x16xf32> to vector<16x16xf32>
    %437 = arith.addf %434, %436 : vector<16x16xf32>
    %cst_165 = arith.constant 0.000000e+00 : f32
    %438 = vector.broadcast %cst_165 : f32 to vector<16x16xf32>
    %439 = arith.maximumf %437, %438 : vector<16x16xf32>
    %440 = arith.truncf %439 : vector<16x16xf32> to vector<16x16xbf16>
    %c0_166 = arith.constant 0 : index
    %c0_167 = arith.constant 0 : index
    %441 = vector.load %arg19[%c0_166, %c0_167] : memref<16x8xbf16, #tpu.memory_space<vmem>>, vector<16x8xbf16>
    %cst_168 = arith.constant dense<0.000000e+00> : vector<16x8xf32>
    %442 = tpu.matmul %440, %441, %cst_168 {dimension_numbers = #tpu.dot_dimension_numbers<[1], [0], [0], [1], [0, 0, 1, 1], [], []>} : vector<16x16xbf16>, vector<16x8xbf16>, vector<16x8xf32> -> vector<16x8xf32>
    %c0_169 = arith.constant 0 : index
    %c0_170 = arith.constant 0 : index
    %443 = vector.load %arg20[%c0_169, %c0_170] : memref<1x8xf32, #tpu.memory_space<vmem>>, vector<1x8xf32>
    %444 = vector.broadcast %443 : vector<1x8xf32> to vector<16x8xf32>
    %445 = arith.addf %442, %444 : vector<16x8xf32>
    %cst_171 = arith.constant 0.000000e+00 : f32
    %446 = vector.broadcast %cst_171 : f32 to vector<16x8xf32>
    %447 = arith.maximumf %445, %446 : vector<16x8xf32>
    %448 = arith.truncf %447 : vector<16x8xf32> to vector<16x8xbf16>
    %c0_172 = arith.constant 0 : index
    %c0_173 = arith.constant 0 : index
    %449 = vector.load %arg21[%c0_172, %c0_173] : memref<8x128xbf16, #tpu.memory_space<vmem>>, vector<8x128xbf16>
    %cst_174 = arith.constant dense<0.000000e+00> : vector<16x128xf32>
    %450 = tpu.matmul %448, %449, %cst_174 {dimension_numbers = #tpu.dot_dimension_numbers<[1], [0], [0], [1], [0, 0, 1, 1], [], []>} : vector<16x8xbf16>, vector<8x128xbf16>, vector<16x128xf32> -> vector<16x128xf32>
    %c0_175 = arith.constant 0 : index
    %c0_176 = arith.constant 0 : index
    %451 = vector.load %arg22[%c0_175, %c0_176] : memref<1x128xf32, #tpu.memory_space<vmem>>, vector<1x128xf32>
    %452 = vector.broadcast %451 : vector<1x128xf32> to vector<16x128xf32>
    %453 = arith.addf %450, %452 : vector<16x128xf32>
    %c0_177 = arith.constant 0 : index
    %c0_178 = arith.constant 0 : index
    %454 = vector.load %arg23[%c0_177, %c0_178] : memref<16x128xf32, #tpu.memory_space<vmem>>, vector<16x128xf32>
    tpu.vector_store %arg23[%c0_177, %c0_178], %453 {strides = array<i32>} : memref<16x128xf32, #tpu.memory_space<vmem>>, vector<16x128xf32>,
    return
  }
}

</mosaic_0001>

<bundles_post_ra>
// kernel: san_forward.1
= control target key start
LH: loop header
LB: loop body
LE: loop exit
PB: predicated region body
PF: predicated region fallthrough
CT: control target
= control target key end

     0   :  { %v3699_v0 = vmov 0.0   ;;  %vm3700_vm0 = vmmov 0   ;;  %vm113_vm1 = vcmask 261120   ;;  %vm391_vm2 = vcmask 64512   ;;  %s4469_s26 = smov 112   ;;  %s4433_s2 = inlined_call_operand.vmem [shape: bf16[2,32,32], index: 2, kind: input, shape index: {}]   ;;  %s4434_s3 = inlined_call_operand.vmem [shape: bf16[2,32,32], index: 3, kind: input, shape index: {}]   ;;  %s4435_s0 = inlined_call_operand.vmem [shape: f32[16,32], index: 0, kind: input, shape index: {}]   ;;  %s4436_s5 = inlined_call_operand.vmem [shape: bf16[2,32,32], index: 5, kind: input, shape index: {}]   ;;  %s4437_s6 = inlined_call_operand.vmem [shape: bf16[2,32,32], index: 6, kind: input, shape index: {}]   ;;  %s4438_s4 = inlined_call_operand.vmem [shape: bf16[2,32,32], index: 4, kind: input, shape index: {}]   ;;  %s4439_s1 = inlined_call_operand.vmem [shape: s8[16,16], index: 1, kind: input, shape index: {}]   ;;  %s4440_s7 = inlined_call_operand.vmem [shape: bf16[2,32,32], index: 7, kind: input, shape index: {}]   ;;  %s4441_s8 = inlined_call_operand.vmem [shape: f32[2,1,32], index: 8, kind: input, shape index: {}]   ;;  %s4442_s11 = inlined_call_operand.vmem [shape: bf16[2,32,64], index: 11, kind: input, shape index: {}]   ;;  %s4443_s13 = inlined_call_operand.vmem [shape: bf16[2,64,32], index: 13, kind: input, shape index: {}]   ;;  %s4444_s9 = inlined_call_operand.vmem [shape: f32[2,1,32], index: 9, kind: input, shape index: {}]   ;;  %s4445_s10 = inlined_call_operand.vmem [shape: f32[2,1,32], index: 10, kind: input, shape index: {}]   ;;  %s4446_s12 = inlined_call_operand.vmem [shape: f32[2,1,64], index: 12, kind: input, shape index: {}]   ;;  %s4447_s14 = inlined_call_operand.vmem [shape: f32[2,1,32], index: 14, kind: input, shape index: {}]   ;;  %s4448_s15 = inlined_call_operand.vmem [shape: f32[2,1,32], index: 15, kind: input, shape index: {}]   ;;  %s4449_s16 = inlined_call_operand.vmem [shape: f32[2,1,32], index: 16, kind: input, shape index: {}]   ;;  %s4450_s17 = inlined_call_operand.vmem [shape: bf16[32,16], index: 17, kind: input, shape index: {}]   ;;  %s4451_s19 = inlined_call_operand.vmem [shape: bf16[16,8], index: 19, kind: input, shape index: {}]   ;;  %s4452_s18 = inlined_call_operand.vmem [shape: f32[1,16], index: 18, kind: input, shape index: {}]   ;;  %s4453_s21 = inlined_call_operand.vmem [shape: bf16[8,128], index: 21, kind: input, shape index: {}]   ;;  %s4454_s20 = inlined_call_operand.vmem [shape: f32[1,8], index: 20, kind: input, shape index: {}]   ;;  %s4455_s22 = inlined_call_operand.vmem [shape: f32[1,128], index: 22, kind: input, shape index: {}]   ;;  %s4456_s23 = inlined_call_operand.vmem [shape: f32[16,128], index: 23, kind: output, shape index: {}]  }
   0x1   :  { %4471 = sst [smem:[#allocation2_spill]] %s4433_s2  ;;  %3241 = vmatprep.subr.bf16.mxu0 %v3699_v0  ;;  %3249 = vmatprep.subr.bf16.mxu1 %v3699_v0  ;;  %v81_v46 = vlaneseq  ;;  %vm498_vm9 = vcmask 130048   ;;  %vm1111_vm10 = vcmask 195584   ;;  %vm1341_vm11 = vcmask 523264  }
   0x2   :  { %4472 = sst [smem:[#allocation3_spill]] %s4434_s3  ;;  %3245 = vmatprep.mubr.msk.bf16.mxu0 %vm3700_vm0, %v3699_v0  ;;  %3253 = vmatprep.mubr.msk.bf16.mxu1 %vm3700_vm0, %v3699_v0  ;;  %vm2921_vm12 = vcmask 1043456  }
   0x3   :  { %4473 = sst [smem:[#allocation4_spill]] %s4435_s0  ;;  %v82_v49 = vshrl.u32 %v81_v46, 7  ;;  %v85_v50 = vand.u32 127, %v81_v46 }
   0x4   :  { %4474 = sst [smem:[#allocation5_spill]] %s4436_s5  ;;  %s4465_s5 = smov 8  }
   0x5   :  { %4475 = sst [smem:[#allocation6_spill]] %s4437_s6  ;;  %vm86_vm3 = vcmp.ne.s32.totalorder %v82_v49, %v85_v50  ;;  %v83_v54 = vadd.s32 8, %v82_v49  ;;  %s4464_s6 = smov 24  }
   0x6   :  { %4476 = sst [smem:[#allocation7_spill]] %s4438_s4  ;;  %s3701_s4 = smov 120  }
   0x7   :  { %4477 = sst [smem:[#allocation8_spill]] %s4439_s1  ;;  %s4467_s1 = smov 104   ;;  %vm87_vm6 = vcmp.ne.s32.totalorder %v83_v54, %v85_v50 }
   0x8   :  { %4478 = sst [smem:[#allocation9_spill]] %s4440_s7 }
   0x9   :  { %s4479_s24 = sld [smem:[#allocation2_spill]] }
   0xa   :  { %s4480_s3 = sld [smem:[#allocation3_spill]] }
   0xb   :  { %s4481_s29 = sld [smem:[#allocation4_spill]] }
   0xc   :  { %s4482_s25 = sld [smem:[#allocation5_spill]] }
   0xd   :  { %s4483_s0 = sld [smem:[#allocation6_spill]] }
   0xe   :  { %s4484_s2 = sld [smem:[#allocation7_spill]] }
   0xf   :  { %v3580_v1 = vld [vmem:[%s4479_s24 + $0x8] sm:$0xff]   ;;  %v3582_v3 = vld [vmem:[%s4479_s24] sm:$0xff]   ;;  %s4485_s28 = sld [smem:[#allocation8_spill]] }
  0x10   :  { %v3581_v2 = vld [vmem:[%s4480_s3 + $0x8] sm:$0xff]   ;;  %3242 = vmatpush3.bf16.msra.mxu0 %v3580_v1  ;;  %v3583_v4 = vld [vmem:[%s4480_s3] sm:$0xff]   ;;  %s4490_s27 = sld [smem:[#allocation9_spill]] }
  0x11   :  { %3250 = vmatpush3.bf16.msra.mxu1 %v3581_v2  ;;  %3243 = vmatprep.subr.bf16.mxu0 %v3699_v0  ;;  %v3851_v5 = vld [vmem:[%s4481_s29] sm:$0xff]  ;;  %v3856_v6 = vld [vmem:[%s4481_s29 + $0x8] sm:$0xff]  ;;  %s4466_s29 = smov 16  }
  0x12   :  { %3251 = vmatprep.subr.bf16.mxu1 %v3699_v0  ;;  %v96_v7 = vpack.c.bf16 %v3856_v6, %v3851_v5  ;;  %v3584_v8 = vld [vmem:[%s4482_s25 + $0x8] sm:$0xff]   ;;  %v3586_v10 = vld [vmem:[%s4482_s25] sm:$0xff]  }
  0x13   :  { %v3585_v9 = vld [vmem:[%s4483_s0 + $0x8] sm:$0xff]   ;;  %v3587_v11 = vld [vmem:[%s4483_s0] sm:$0xff]  }
  0x14   :  { %3244 = vmatpush3.bf16.msra.mxu0 %v3582_v3  ;;  %v3588_v12 = vld [vmem:[%s4484_s2 + $0x8] sm:$0xff]   ;;  %v3589_v13 = vld [vmem:[%s4484_s2] sm:$0xff]  }
  0x15   :  { %3252 = vmatpush3.bf16.msra.mxu1 %v3583_v4  ;;  %3257 = vmatprep.subr.bf16.mxu0 %v3699_v0  ;;  %v3131_v47 = vld [vmem:[%s4485_s28] sm:$0xf]   ;;  %s4492_s28 = smov 104  }
  0x16   :  { %3265 = vmatprep.subr.bf16.mxu1 %v3699_v0  ;;  %v3132_v48 = vunpack.c.0.s8 %v3131_v47  ;;  %v3133_v53 = vunpack.c.1.s8 %v3131_v47 }
  0x17   :  { %3246 = vmatmul.mubr.msk.bf16.vlgmr.msra.gmra.mxu0 %vm113_vm1, %v96_v7 }
  0x18   :  { %3254 = vmatmul.mubr.msk.bf16.vlgmr.msra.gmra.mxu1 %vm113_vm1, %v96_v7  ;;  %3258 = vmatpush3.bf16.msra.mxu0 %v3584_v8  ;;  %vm88_vm4 = vcmp.gt.s32.totalorder %v3132_v48, 0  ;;  %vm89_vm7 = vcmp.gt.s32.totalorder %v3133_v53, 0  ;;  %v3704_v8 = vmov 0.09090909  }
  0x19   :  { %3266 = vmatpush3.bf16.msra.mxu1 %v3585_v9  ;;  %3259 = vmatprep.subr.bf16.mxu0 %v3699_v0  ;;  %vm3937_vm5 = vmand %vm88_vm4, %vm86_vm3 }
  0x1a   :  { %3267 = vmatprep.subr.bf16.mxu1 %v3699_v0  ;;  %3261 = vmatprep.mubr.msk.bf16.mxu0 %vm3700_vm0, %v3699_v0  ;;  %vm3944_vm8 = vmand %vm89_vm7, %vm87_vm6  ;;  %v92_v9 = vsel %vm3937_vm5, 0.90909094, %v3704_v8 }
  0x1b   :  { %3269 = vmatprep.mubr.msk.bf16.mxu1 %vm3700_vm0, %v3699_v0 }
  0x1c   :  { %3260 = vmatpush3.bf16.msra.mxu0 %v3586_v10  ;;  %v93_v10 = vsel %vm3944_vm8, 0.90909094, %v3704_v8 }
  0x1d   :  { %3268 = vmatpush3.bf16.msra.mxu1 %v3587_v11  ;;  %3273 = vmatprep.subr.bf16.mxu0 %v3699_v0 }
  0x1e   :  { %3281 = vmatprep.subr.bf16.mxu1 %v3699_v0 }
  0x1f   :  { %3262 = vmatmul.mubr.msk.bf16.vlgmr.msra.gmra.mxu0 %vm113_vm1, %v96_v7 }
  0x20   :  { %3270 = vmatmul.mubr.msk.bf16.vlgmr.msra.gmra.mxu1 %vm113_vm1, %v96_v7  ;;  %3274 = vmatpush3.bf16.msra.mxu0 %v3588_v12  ;;  %v3955_v12 = vsel %vm86_vm3, %v92_v9, 0.0 }
  0x21   :  { %3275 = vmatprep.subr.bf16.mxu0 %v3699_v0  ;;  %3277 = vmatprep.mubr.msk.bf16.mxu0 %vm3700_vm0, %v3699_v0 }
  0x22   :  { %3283 = vmatprep.mubr.msk.bf16.mxu1 %vm3700_vm0, %v3699_v0 }
  0x24   :  { %3276 = vmatpush3.bf16.msra.mxu0 %v3589_v13  ;;  %v3958_v13 = vsel %vm87_vm6, %v93_v10, 0.0 }
  0x25   :  { %3287 = vmatprep.subr.bf16.mxu0 %v3699_v0 }
  0x27   :  { %3278 = vmatmul.mubr.msk.bf16.vlgmr.msra.gmra.mxu0 %vm113_vm1, %v96_v7 }
  0x28   :  { %3289 = vmatprep.mubr.msk.bf16.mxu0 %vm3700_vm0, %v3699_v0 }
  0xd7   :  { %v151_v14 = vpop.f32.mrf.mxu0 }
  0xd8   :  { %v209_v15 = vpop.f32.mrf.mxu1 }
  0xd9   :  { %v3247_v16 = vpop.f32.mrf.mxu0 }
  0xda   :  { %v3255_v17 = vpop.f32.mrf.mxu1 }
  0xdb   :  { %v154_v18 = vpop.f32.mrf.mxu0 }
  0xdc   :  { %v158_v19 = vpack.c.bf16 %v154_v18, %v151_v14  ;;  %v212_v20 = vpop.f32.mrf.mxu1 }
  0xdd   :  { %v216_v21 = vpack.c.bf16 %v212_v20, %v209_v15  ;;  %v3248_v22 = vpop.f32.mrf.mxu0 }
  0xde   :  { %v3256_v23 = vpop.f32.mrf.mxu1  ;;  %557 = vrot.lane.b32.xlu1 %v158_v19, %s3701_s4 }
  0xdf   :  { %560 = vrot.lane.b32.xlu0 %v216_v21, %s3701_s4  ;;  %v267_v24 = vpop.f32.mrf.mxu0  ;;  %v396_v25 = vsel %vm391_vm2, %v216_v21, 0 }
  0xe0   :  { %v325_v26 = vpop.f32.mrf.mxu1  ;;  %3282 = vmatpush3.bf16.xpose.msra.mxu1 %v396_v25 }
  0xe1   :  { %v3263_v27 = vpop.f32.mrf.mxu0  ;;  %3293 = vmatprep.subr.bf16.mxu1 %v3699_v0 }
  0xe2   :  { %v3271_v28 = vpop.f32.mrf.mxu1 }
  0xe3   :  { %v270_v29 = vpop.f32.mrf.mxu0 }
  0xe4   :  { %v274_v30 = vpack.c.bf16 %v270_v29, %v267_v24  ;;  %v328_v31 = vpop.f32.mrf.mxu1 }
  0xe5   :  { %v332_v32 = vpack.c.bf16 %v328_v31, %v325_v26  ;;  %v3264_v33 = vpop.f32.mrf.mxu0 }
  0xe6   :  { %v3272_v34 = vpop.f32.mrf.mxu1  ;;  %610 = vrot.lane.b32.xlu1 %v274_v30, %s3701_s4 }
  0xe7   :  { %613 = vrot.lane.b32.xlu0 %v332_v32, %s3701_s4  ;;  %3284 = vmatmul.mubr.msk.bf16.vlgmr.msra.gmra.mxu1 %vm391_vm2, %v158_v19  ;;  %v383_v35 = vpop.f32.mrf.mxu0  ;;  %v443_v36 = vsel %vm391_vm2, %v332_v32, 0 }
  0xe8   :  { %3288 = vmatpush3.bf16.xpose.msra.mxu0 %v443_v36  ;;  %3295 = vmatprep.mubr.msk.bf16.mxu1 %vm3700_vm0, %v3699_v0 }
  0xe9   :  { %v3279_v37 = vpop.f32.mrf.mxu0  ;;  %3299 = vmatprep.subr.bf16.mxu0 %v3699_v0 }
  0xea   :  { %737 = vrot.lane.b32.xlu1 %v216_v21, %s4469_s26 }
  0xeb   :  { %v386_v38 = vpop.f32.mrf.mxu0 }
  0xec   :  { %v390_v39 = vpack.c.bf16 %v386_v38, %v383_v35 }
  0xed   :  { %v3280_v40 = vpop.f32.mrf.mxu0 }
  0xee   :  { %735 = vrot.lane.b32.xlu1 %v158_v19, %s4469_s26  ;;  %682 = vrot.lane.b32.xlu0 %v390_v39, %s3701_s4 }
  0xef   :  { %3290 = vmatmul.mubr.msk.bf16.vlgmr.msra.gmra.mxu0 %vm391_vm2, %v274_v30  ;;  %3294 = vmatpush3.bf16.msra.mxu1 %v390_v39 }
  0xf0   :  { %3301 = vmatprep.mubr.msk.bf16.mxu0 %vm3700_vm0, %v3699_v0  ;;  %3305 = vmatprep.subr.bf16.mxu1 %v3699_v0 }
  0xf2   :  { %856 = vrot.lane.b32.xlu1 %v390_v39, %s4469_s26  ;;  %788 = vrot.lane.b32.xlu0 %v332_v32, %s4469_s26 }
  0xf6   :  { %962 = vrot.lane.b32.xlu1 %v332_v32, %s4467_s1  ;;  %786 = vrot.lane.b32.xlu0 %v274_v30, %s4469_s26 }
  0xfa   :  { %960 = vrot.lane.b32.xlu1 %v274_v30, %s4467_s1  ;;  %911 = vrot.lane.b32.xlu0 %v216_v21, %s4467_s1 }
  0xfe   :  { %909 = vrot.lane.b32.xlu0 %v158_v19, %s4467_s1 }
 0x102   :  { %1030 = vrot.lane.b32.xlu0 %v390_v39, %s4467_s1 }
 0x150   :  { %v558_v43 = vpop.permute.xlu1 %557 }
 0x151   :  { %v561_v41 = vpop.permute.xlu0 %560 }
 0x152   :  { %v566_v42 = vsel %vm391_vm2, %v561_v41, 0 }
 0x153   :  { %3300 = vmatpush3.bf16.xpose.msra.mxu0 %v566_v42 }
 0x154   :  { %3311 = vmatprep.subr.bf16.mxu0 %v3699_v0 }
 0x158   :  { %v611_v17 = vpop.permute.xlu1 %610 }
 0x159   :  { %v614_v44 = vpop.permute.xlu0 %613 }
 0x15a   :  { %3302 = vmatmul.mubr.msk.bf16.vlgmr.msra.gmra.mxu0 %vm391_vm2, %v558_v43  ;;  %v619_v19 = vsel %vm391_vm2, %v614_v44, 0 }
 0x15b   :  { %3313 = vmatprep.mubr.msk.bf16.mxu0 %vm3700_vm0, %v3699_v0 }
 0x15c   :  { %v738_v20 = vpop.permute.xlu1 %737 }
 0x15d   :  { %v743_v21 = vsel %vm391_vm2, %v738_v20, 0 }
 0x160   :  { %v683_v45 = vpop.permute.xlu0 %682  ;;  %v736_v22 = vpop.permute.xlu1 %735 }
 0x161   :  { %3312 = vmatpush3.bf16.msra.mxu0 %v683_v45 }
 0x162   :  { %3323 = vmatprep.subr.bf16.mxu0 %v3699_v0 }
 0x164   :  { %v857_v23 = vpop.permute.xlu1 %856  ;;  %v789_v48 = vpop.permute.xlu0 %788 }
 0x168   :  { %v787_v54 = vpop.permute.xlu0 %786 }
 0x1a7   :  { %v432_v51 = vpop.f32.mrf.mxu1 }
 0x1a9   :  { %v3285_v52 = vpop.f32.mrf.mxu1 }
 0x1ab   :  { %v435_v55 = vpop.f32.mrf.mxu1 }
 0x1ad   :  { %v3286_v56 = vpop.f32.mrf.mxu1 }
 0x1ae   :  { %v912_v56 = vpop.permute.xlu0 %911 }
 0x1af   :  { %v479_v58 = vpop.f32.mrf.mxu0 }
 0x1b0   :  { %v486_v59 = vsel %vm3937_vm5, %v432_v51, %v479_v58  ;;  %v917_v58 = vsel %vm391_vm2, %v912_v56, 0 }
 0x1b1   :  { %v2989_v60 = vclamps-f32 %v486_v59, 5.0  ;;  %v3291_v61 = vpop.f32.mrf.mxu0 }
 0x1b2   :  { %v910_v59 = vpop.permute.xlu0 %909  ;;  %v963_v61 = vpop.permute.xlu1 %962 }
 0x1b3   :  { %v492_v63 = vmul.f32 1.442695, %v2989_v60  ;;  %v482_v1 = vpop.f32.mrf.mxu0 }
 0x1b4   :  { %v487_v2 = vsel %vm3944_vm8, %v435_v55, %v482_v1  ;;  %v794_v55 = vsel %vm391_vm2, %v789_v48, 0 }
 0x1b5   :  { %v2990_v3 = vclamps-f32 %v487_v2, 5.0  ;;  %v3292_v4 = vpop.f32.mrf.mxu0  ;;  %3619 = vpow2.f32 %v492_v63 }
 0x1b6   :  { %v1031_v60 = vpop.permute.xlu0 %1030  ;;  %v961_v63 = vpop.permute.xlu1 %960 }
 0x1b7   :  { %v494_v7 = vmul.f32 1.442695, %v2990_v3 }
 0x1b9   :  { %3621 = vpow2.f32 %v494_v7 }
 0x1c2   :  { %v3620_v11 = vpop.eup %3619 }
 0x1c3   :  { %v3961_v15 = vmul.f32 %v3620_v11, %v3955_v12 }
 0x1c6   :  { %v3622_v14 = vpop.eup %3621 }
 0x1c7   :  { %v3964_v16 = vmul.f32 %v3622_v14, %v3958_v13 }
 0x1c9   :  { %v505_v18 = vpack.c.bf16 %v3964_v16, %v3961_v15 }
 0x1cb   :  { %3296 = vmatmul.mubr.msk.bf16.vlgmr.msra.gmra.mxu1 %vm498_vm9, %v505_v18 }
 0x1cc   :  { %3306 = vmatpush3.bf16.xpose.msra.mxu1 %v619_v19  ;;  %3307 = vmatprep.mubr.msk.bf16.mxu1 %vm3700_vm0, %v3699_v0 }
 0x1cd   :  { %3317 = vmatprep.subr.bf16.mxu1 %v3699_v0 }
 0x1d3   :  { %3308 = vmatmul.mubr.msk.bf16.vlgmr.msra.gmra.mxu1 %vm391_vm2, %v611_v17 }
 0x1d4   :  { %3318 = vmatpush3.bf16.xpose.msra.mxu1 %v743_v21  ;;  %3319 = vmatprep.mubr.msk.bf16.mxu1 %vm3700_vm0, %v3699_v0 }
 0x1d5   :  { %3329 = vmatprep.subr.bf16.mxu1 %v3699_v0 }
 0x1db   :  { %3320 = vmatmul.mubr.msk.bf16.vlgmr.msra.gmra.mxu1 %vm391_vm2, %v736_v22 }
 0x1dc   :  { %3330 = vmatpush3.bf16.msra.mxu1 %v857_v23  ;;  %3331 = vmatprep.mubr.msk.bf16.mxu1 %vm3700_vm0, %v3699_v0 }
 0x1dd   :  { %3341 = vmatprep.subr.bf16.mxu1 %v3699_v0 }
 0x21a   :  { %v602_v24 = vpop.f32.mrf.mxu0 }
 0x21c   :  { %v3303_v25 = vpop.f32.mrf.mxu0 }
 0x21e   :  { %v605_v26 = vpop.f32.mrf.mxu0 }
 0x220   :  { %v3304_v27 = vpop.f32.mrf.mxu0 }
 0x28b   :  { %v3982_v28 = vpop.f32.mrf.mxu1 }
 0x28d   :  { %v3297_v29 = vpop.f32.mrf.mxu1 }
 0x28f   :  { %v3984_v30 = vpop.f32.mrf.mxu1 }
 0x291   :  { %v3298_v31 = vpop.f32.mrf.mxu1 }
 0x293   :  { %v655_v32 = vpop.f32.mrf.mxu1 }
 0x294   :  { %v662_v33 = vsel %vm3937_vm5, %v602_v24, %v655_v32 }
 0x295   :  { %v2994_v34 = vclamps-f32 %v662_v33, 5.0  ;;  %v3309_v35 = vpop.f32.mrf.mxu1 }
 0x297   :  { %v668_v36 = vmul.f32 1.442695, %v2994_v34  ;;  %v658_v37 = vpop.f32.mrf.mxu1 }
 0x298   :  { %v663_v38 = vsel %vm3944_vm8, %v605_v26, %v658_v37 }
 0x299   :  { %3623 = vpow2.f32 %v668_v36  ;;  %v2995_v39 = vclamps-f32 %v663_v38, 5.0  ;;  %v3310_v40 = vpop.f32.mrf.mxu1 }
 0x29b   :  { %v670_v41 = vmul.f32 1.442695, %v2995_v39  ;;  %v779_v42 = vpop.f32.mrf.mxu1 }
 0x29d   :  { %3625 = vpow2.f32 %v670_v41  ;;  %v3321_v43 = vpop.f32.mrf.mxu1 }
 0x29e   :  { %v968_v43 = vsel %vm391_vm2, %v963_v61, 0 }
 0x29f   :  { %v782_v44 = vpop.f32.mrf.mxu1 }
 0x2a1   :  { %v3322_v45 = vpop.f32.mrf.mxu1 }
 0x2a6   :  { %v3624_v46 = vpop.eup %3623 }
 0x2a7   :  { %v672_v47 = vmul.f32 %v3624_v46, %v3955_v12 }
 0x2a9   :  { %v674_v49 = vsel %vm498_vm9, %v672_v47, 0.0 }
 0x2aa   :  { %v3626_v50 = vpop.eup %3625  ;;  %675 = vadd.xlane.f32.xlu1 %v674_v49 }
 0x2ab   :  { %v673_v51 = vmul.f32 %v3626_v50, %v3958_v13 }
 0x2ad   :  { %v677_v52 = vsel %vm498_vm9, %v673_v51, 0.0  ;;  %v680_v53 = vpack.c.bf16 %v673_v51, %v672_v47 }
 0x2ae   :  { %678 = vadd.xlane.f32.xlu0 %v677_v52 }
 0x2af   :  { %3314 = vmatmul.mubr.msk.bf16.vlgmr.msra.gmra.mxu0 %vm498_vm9, %v680_v53 }
 0x2b0   :  { %3324 = vmatpush3.bf16.xpose.msra.mxu0 %v794_v55  ;;  %3325 = vmatprep.mubr.msk.bf16.mxu0 %vm3700_vm0, %v3699_v0 }
 0x2b1   :  { %3335 = vmatprep.subr.bf16.mxu0 %v3699_v0 }
 0x2b7   :  { %3326 = vmatmul.mubr.msk.bf16.vlgmr.msra.gmra.mxu0 %vm391_vm2, %v787_v54 }
 0x2b8   :  { %3336 = vmatpush3.bf16.xpose.msra.mxu0 %v917_v58  ;;  %3337 = vmatprep.mubr.msk.bf16.mxu0 %vm3700_vm0, %v3699_v0 }
 0x2b9   :  { %3347 = vmatprep.subr.bf16.mxu0 %v3699_v0 }
 0x2bf   :  { %3338 = vmatmul.mubr.msk.bf16.vlgmr.msra.gmra.mxu0 %vm391_vm2, %v910_v59 }
 0x2c0   :  { %3348 = vmatpush3.bf16.msra.mxu0 %v1031_v60  ;;  %3349 = vmatprep.mubr.msk.bf16.mxu0 %vm3700_vm0, %v3699_v0 }
 0x2c1   :  { %3361 = vmatprep.subr.bf16.mxu0 %v3699_v0 }
 0x333   :  { %v676_v1 = vpop.xlane.xlu1 %675 }
 0x334   :  { %v729_v3 = vadd.f32 1e-06, %v676_v1 }
 0x336   :  { %3627 = vrcp.f32 %v729_v3 }
 0x337   :  { %v679_v2 = vpop.xlane.xlu0 %678 }
 0x338   :  { %v730_v4 = vadd.f32 1e-06, %v679_v2 }
 0x33a   :  { %3629 = vrcp.f32 %v730_v4 }
 0x343   :  { %v3628_v9 = vpop.eup %3627 }
 0x347   :  { %v3630_v10 = vpop.eup %3629 }
 0x36f   :  { %v722_v7 = vpop.f32.mrf.mxu0 }
 0x370   :  { %v4008_v14 = vmul.f32 %v3628_v9, %v722_v7 }
 0x371   :  { %v3315_v8 = vpop.f32.mrf.mxu0 }
 0x372   :  { %v499_v8 = vsel %vm498_vm9, %v3961_v15, 0.0 }
 0x373   :  { %v725_v11 = vpop.f32.mrf.mxu0 }
 0x374   :  { %v4010_v17 = vmul.f32 %v3630_v10, %v725_v11  ;;  %v502_v11 = vsel %vm498_vm9, %v3964_v16, 0.0 }
 0x375   :  { %v3316_v18 = vpop.f32.mrf.mxu0 }
 0x376   :  { %v3550_v19 = vpack.i.bf16 %v4010_v17, %v4008_v14 }
 0x377   :  { %v830_v20 = vpop.f32.mrf.mxu0 }
 0x378   :  { %v837_v21 = vsel %vm3937_vm5, %v779_v42, %v830_v20 }
 0x379   :  { %v2999_v22 = vclamps-f32 %v837_v21, 5.0  ;;  %v3327_v23 = vpop.f32.mrf.mxu0 }
 0x37a   :  { %v3590_v23 = vld [vmem:[%s4490_s27 + $0x8] sm:$0xff]  }
 0x37b   :  { %v843_v24 = vmul.f32 1.442695, %v2999_v22  ;;  %v833_v25 = vpop.f32.mrf.mxu0 }
 0x37c   :  { %v838_v26 = vsel %vm3944_vm8, %v782_v44, %v833_v25 }
 0x37d   :  { %3631 = vpow2.f32 %v843_v24  ;;  %v3000_v27 = vclamps-f32 %v838_v26, 5.0  ;;  %v3328_v29 = vpop.f32.mrf.mxu0 }
 0x37f   :  { %v845_v31 = vmul.f32 1.442695, %v3000_v27  ;;  %v953_v32 = vpop.f32.mrf.mxu0  ;;  %v3591_v27 = vld [vmem:[%s4490_s27] sm:$0xff]  }
 0x381   :  { %3633 = vpow2.f32 %v845_v31  ;;  %v3339_v33 = vpop.f32.mrf.mxu0 }
 0x383   :  { %v956_v34 = vpop.f32.mrf.mxu0 }
 0x385   :  { %v3340_v35 = vpop.f32.mrf.mxu0 }
 0x38a   :  { %v3632_v36 = vpop.eup %3631 }
 0x38b   :  { %v847_v37 = vmul.f32 %v3632_v36, %v3955_v12 }
 0x38d   :  { %v849_v38 = vsel %vm498_vm9, %v847_v37, 0.0 }
 0x38e   :  { %v3634_v39 = vpop.eup %3633  ;;  %850 = vadd.xlane.f32.xlu0 %v849_v38 }
 0x38f   :  { %v848_v40 = vmul.f32 %v3634_v39, %v3958_v13 }
 0x391   :  { %v852_v41 = vsel %vm498_vm9, %v848_v40, 0.0  ;;  %v855_v42 = vpack.c.bf16 %v848_v40, %v847_v37 }
 0x392   :  { %853 = vadd.xlane.f32.xlu1 %v852_v41 }
 0x393   :  { %3332 = vmatmul.mubr.msk.bf16.vlgmr.msra.gmra.mxu1 %vm498_vm9, %v855_v42 }
 0x394   :  { %3342 = vmatpush3.bf16.xpose.msra.mxu1 %v968_v43  ;;  %3343 = vmatprep.mubr.msk.bf16.mxu1 %vm3700_vm0, %v3699_v0 }
 0x395   :  { %3353 = vmatprep.subr.bf16.mxu1 %v3699_v0 }
 0x39b   :  { %3344 = vmatmul.mubr.msk.bf16.vlgmr.msra.gmra.mxu1 %vm391_vm2, %v961_v63 }
 0x39c   :  { %3357 = vmatprep.mubr.msk.bf16.mxu1 %vm3700_vm0, %v3699_v0  ;;  %3354 = vmatpush3.bf16.msra.mxu1 %v3590_v23 }
 0x39d   :  { %3355 = vmatprep.subr.bf16.mxu1 %v3699_v0 }
 0x3a0   :  { %3356 = vmatpush3.bf16.msra.mxu1 %v3591_v27 }
 0x3a1   :  { %3369 = vmatprep.subr.bf16.mxu1 %v3699_v0 }
 0x417   :  { %v851_v2 = vpop.xlane.xlu0 %850 }
 0x418   :  { %v903_v7 = vadd.f32 1e-06, %v851_v2 }
 0x41b   :  { %v854_v61 = vpop.xlane.xlu1 %853 }
 0x41c   :  { %v904_v3 = vadd.f32 1e-06, %v854_v61 }
 0x453   :  { %v896_v44 = vpop.f32.mrf.mxu1 }
 0x455   :  { %v3333_v45 = vpop.f32.mrf.mxu1 }
 0x457   :  { %v899_v46 = vpop.f32.mrf.mxu1 }
 0x459   :  { %v3334_v47 = vpop.f32.mrf.mxu1 }
 0x45b   :  { %v1004_v48 = vpop.f32.mrf.mxu1 }
 0x45c   :  { %v1011_v49 = vsel %vm3937_vm5, %v953_v32, %v1004_v48 }
 0x45d   :  { %v3004_v50 = vclamps-f32 %v1011_v49, 5.0  ;;  %v3345_v51 = vpop.f32.mrf.mxu1 }
 0x45f   :  { %v1017_v52 = vmul.f32 1.442695, %v3004_v50  ;;  %v1007_v53 = vpop.f32.mrf.mxu1 }
 0x460   :  { %v1012_v54 = vsel %vm3944_vm8, %v956_v34, %v1007_v53 }
 0x461   :  { %3635 = vpow2.f32 %v1017_v52  ;;  %v3005_v55 = vclamps-f32 %v1012_v54, 5.0  ;;  %v3346_v56 = vpop.f32.mrf.mxu1 }
 0x463   :  { %v1019_v58 = vmul.f32 1.442695, %v3005_v55 }
 0x465   :  { %3637 = vpow2.f32 %v1019_v58 }
 0x466   :  { %3639 = vrcp.f32 %v904_v3 }
 0x467   :  { %3641 = vrcp.f32 %v903_v7 }
 0x46e   :  { %v3636_v59 = vpop.eup %3635 }
 0x46f   :  { %v1021_v60 = vmul.f32 %v3636_v59, %v3955_v12 }
 0x471   :  { %v1023_v63 = vsel %vm498_vm9, %v1021_v60, 0.0 }
 0x472   :  { %v3638_v1 = vpop.eup %3637  ;;  %1024 = vadd.xlane.f32.xlu0 %v1023_v63 }
 0x473   :  { %v1022_v4 = vmul.f32 %v3638_v1, %v3958_v13  ;;  %v3640_v18 = vpop.eup %3639 }
 0x474   :  { %v908_v20 = vmul.f32 %v3640_v18, %v899_v46  ;;  %v3642_v21 = vpop.eup %3641 }
 0x475   :  { %v1026_v9 = vsel %vm498_vm9, %v1022_v4, 0.0  ;;  %v1029_v10 = vpack.c.bf16 %v1022_v4, %v1021_v60  ;;  %v907_v15 = vmul.f32 %v3642_v21, %v896_v44  ;;  %v3010_v60 = vld [vmem:[%s4441_s8] ss:$0 sm:$0xff] }
 0x476   :  { %500 = vadd.xlane.f32.xlu0 %v499_v8  ;;  %1027 = vadd.xlane.f32.xlu1 %v1026_v9 }
 0x477   :  { %3350 = vmatmul.mubr.msk.bf16.vlgmr.msra.gmra.mxu0 %vm498_vm9, %v1029_v10  ;;  %v3555_v22 = vpack.i.bf16 %v908_v20, %v907_v15 }
 0x478   :  { %3365 = vmatprep.mubr.msk.bf16.mxu0 %vm3700_vm0, %v3699_v0 }
 0x47a   :  { %503 = vadd.xlane.f32.xlu1 %v502_v11 }
 0x48b   :  { %3556 = vrot.lane.b32.xlu1 %v3555_v22, %s4466_s29  ;;  %s4494_s29 = smov 8  }
 0x48c   :  { %3551 = vrot.lane.b32.xlu0 %v3550_v19, %s4465_s5 }
 0x4fb   :  { %v1025_v16 = vpop.xlane.xlu0 %1024 }
 0x4fc   :  { %v1077_v25 = vadd.f32 1e-06, %v1025_v16  ;;  %v3592_v16 = vld [vmem:[%s4442_s11 + $0x8] sm:$0xff]  }
 0x4fd   :  { %3362 = vmatpush3.bf16.msra.mxu0 %v3592_v16 }
 0x4fe   :  { %3643 = vrcp.f32 %v1077_v25  ;;  %3363 = vmatprep.subr.bf16.mxu0 %v3699_v0  ;;  %v3594_v25 = vld [vmem:[%s4443_s13 + $0x18] sm:$0xff]  }
 0x4ff   :  { %v1028_v24 = vpop.xlane.xlu1 %1027  ;;  %v501_v36 = vpop.xlane.xlu0 %500 }
 0x500   :  { %v1078_v26 = vadd.f32 1e-06, %v1028_v24  ;;  %v550_v38 = vadd.f32 1e-06, %v501_v36  ;;  %v3593_v24 = vld [vmem:[%s4442_s11] sm:$0xff]  }
 0x501   :  { %3364 = vmatpush3.bf16.msra.mxu0 %v3593_v24 }
 0x502   :  { %3645 = vrcp.f32 %v1078_v26  ;;  %3381 = vmatprep.subr.bf16.mxu0 %v3699_v0 }
 0x503   :  { %v504_v37 = vpop.xlane.xlu1 %503  ;;  %3647 = vrcp.f32 %v550_v38  ;;  %v3552_v42 = vpop.permute.xlu0 %3551 }
 0x504   :  { %v551_v39 = vadd.f32 1e-06, %v504_v37  ;;  %v3554_v46 = vunpack.i.h.bf16 %v3552_v42  ;;  %v3553_v47 = vunpack.i.l.bf16 %v3552_v42  ;;  %v3012_v37 = vld [vmem:[%s4445_s10] ss:$0 sm:$0xff]  ;;  %v3595_v42 = vld [vmem:[%s4443_s13 + $0x10] sm:$0xff]  }
 0x506   :  { %3649 = vrcp.f32 %v551_v39 }
 0x507   :  { %v3557_v45 = vpop.permute.xlu1 %3556 }
 0x508   :  { %v3559_v50 = vunpack.i.h.bf16 %v3557_v45  ;;  %v3558_v51 = vunpack.i.l.bf16 %v3557_v45  ;;  %v3013_v45 = vld [vmem:[%s4446_s12] ss:$0 sm:$0xff] }
 0x50b   :  { %v3644_v19 = vpop.eup %3643 }
 0x50f   :  { %v3646_v29 = vpop.eup %3645 }
 0x510   :  { %v3648_v40 = vpop.eup %3647 }
 0x511   :  { %v554_v43 = vmul.f32 %v3648_v40, %v3982_v28 }
 0x513   :  { %v3650_v41 = vpop.eup %3649  ;;  %v1107_v48 = vsel %vm391_vm2, %v554_v43, %v3553_v47  ;;  %v3596_v43 = vld [vmem:[%s4443_s13 + $0x8] sm:$0xff]  }
 0x514   :  { %v555_v44 = vmul.f32 %v3650_v41, %v3984_v30  ;;  %v1109_v56 = vsel %vm498_vm9, %v1107_v48, %v3558_v51 }
 0x516   :  { %v1108_v49 = vsel %vm391_vm2, %v555_v44, %v3554_v46  ;;  %v3597_v44 = vld [vmem:[%s4443_s13] sm:$0xff]  }
 0x517   :  { %v1110_v55 = vsel %vm498_vm9, %v1108_v49, %v3559_v50 }
 0x537   :  { %v1070_v14 = vpop.f32.mrf.mxu0 }
 0x538   :  { %v1081_v32 = vmul.f32 %v3644_v19, %v1070_v14 }
 0x539   :  { %v3351_v17 = vpop.f32.mrf.mxu0 }
 0x53b   :  { %v1073_v31 = vpop.f32.mrf.mxu0 }
 0x53c   :  { %v1082_v33 = vmul.f32 %v3646_v29, %v1073_v31 }
 0x53d   :  { %v3352_v34 = vpop.f32.mrf.mxu0 }
 0x53e   :  { %v3560_v35 = vpack.i.bf16 %v1082_v33, %v1081_v32  ;;  %v3011_v33 = vld [vmem:[%s4444_s9] ss:$0 sm:$0xff] }
 0x540   :  { %3561 = vrot.lane.b32.xlu1 %v3560_v35, %s4464_s6 }
 0x5b2   :  { %v3562_v52 = vpop.permute.xlu1 %3561 }
 0x5b3   :  { %v3564_v53 = vunpack.i.h.bf16 %v3562_v52  ;;  %v3563_v54 = vunpack.i.l.bf16 %v3562_v52 }
 0x5b5   :  { %v1113_v28 = vsel %vm1111_vm10, %v1110_v55, %v3564_v53  ;;  %v1112_v30 = vsel %vm1111_vm10, %v1109_v56, %v3563_v54  ;;  %v3017_v55 = vld [vmem:[%s4447_s14] ss:$0 sm:$0xff] }
 0x5b6   :  { %v1114_v58 = vpack.c.bf16 %v1113_v28, %v1112_v30 }
 0x5b8   :  { %3358 = vmatmul.mubr.msk.bf16.vlgmr.msra.gmra.mxu1 %vm113_vm1, %v1114_v58 }
 0x5b9   :  { %3377 = vmatprep.mubr.msk.bf16.mxu1 %vm3700_vm0, %v3699_v0  ;;  %3370 = vmatpush3.bf16.msra.mxu1 %v3594_v25 }
 0x5ba   :  { %3371 = vmatprep.subr.bf16.mxu1 %v3699_v0 }
 0x5bd   :  { %3372 = vmatpush3.bf16.msra.mxu1 %v3595_v42  ;;  %v3606_v42 = vld [vmem:[%s4483_s0 + $0x18] sm:$0xff]  }
 0x5be   :  { %3373 = vmatprep.subr.bf16.mxu1 %v3699_v0 }
 0x5c1   :  { %3374 = vmatpush3.bf16.msra.mxu1 %v3596_v43  ;;  %v3607_v43 = vld [vmem:[%s4483_s0 + $0x10] sm:$0xff]   ;;  %s4491_s0 = smov 112  }
 0x5c2   :  { %3375 = vmatprep.subr.bf16.mxu1 %v3699_v0 }
 0x5c5   :  { %3376 = vmatpush3.bf16.msra.mxu1 %v3597_v44 }
 0x5c6   :  { %3397 = vmatprep.subr.bf16.mxu1 %v3699_v0 }
 0x678   :  { %v1168_v59 = vpop.f32.mrf.mxu1 }
 0x679   :  { %v1175_v61 = vadd.f32 %v1168_v59, %v3851_v5 }
 0x67a   :  { %v3359_v63 = vpop.f32.mrf.mxu1 }
 0x67b   :  { %v1184_v1 = vadd.f32 %v3010_v60, %v1175_v61 }
 0x67c   :  { %v1171_v2 = vpop.f32.mrf.mxu1 }
 0x67d   :  { %v1176_v3 = vadd.f32 %v1171_v2, %v3856_v6  ;;  %v1186_v4 = vsel %vm113_vm1, %v1184_v1, 0.0 }
 0x67e   :  { %1187 = vadd.xlane.f32.xlu0 %v1186_v4  ;;  %v3360_v7 = vpop.f32.mrf.mxu1 }
 0x67f   :  { %v1185_v8 = vadd.f32 %v3010_v60, %v1176_v3 }
 0x681   :  { %v1189_v9 = vsel %vm113_vm1, %v1185_v8, 0.0 }
 0x682   :  { %1190 = vadd.xlane.f32.xlu1 %v1189_v9 }
 0x707   :  { %v1188_v10 = vpop.xlane.xlu0 %1187 }
 0x708   :  { %v1193_v11 = vmul.f32 0.03125, %v1188_v10 }
 0x70a   :  { %v1195_v18 = vsub.f32 %v1184_v1, %v1193_v11 }
 0x70b   :  { %v1191_v20 = vpop.xlane.xlu1 %1190 }
 0x70c   :  { %v1194_v21 = vmul.f32 0.03125, %v1191_v20  ;;  %v1197_v15 = vmul.f32 %v1195_v18, %v1195_v18 }
 0x70e   :  { %v1196_v5 = vsub.f32 %v1185_v8, %v1194_v21  ;;  %v1199_v22 = vsel %vm113_vm1, %v1197_v15, 0.0  ;;  %v3598_v15 = vld [vmem:[%s4479_s24 + $0x18] sm:$0xff]  }
 0x70f   :  { %1200 = vadd.xlane.f32.xlu0 %v1199_v22  ;;  %v3600_v22 = vld [vmem:[%s4479_s24 + $0x10] sm:$0xff]   ;;  %s4495_s24 = smov 24  }
 0x710   :  { %v1198_v23 = vmul.f32 %v1196_v5, %v1196_v5 }
 0x712   :  { %v1202_v6 = vsel %vm113_vm1, %v1198_v23, 0.0  ;;  %v3601_v23 = vld [vmem:[%s4482_s25 + $0x10] sm:$0xff]  }
 0x713   :  { %1203 = vadd.xlane.f32.xlu0 %v1202_v6 }
 0x798   :  { %v1201_v26 = vpop.xlane.xlu0 %1200 }
 0x799   :  { %v1205_v27 = vmul.f32 0.03125, %v1201_v26 }
 0x79b   :  { %v1207_v14 = vadd.f32 1e-05, %v1205_v27 }
 0x79c   :  { %v1204_v17 = vpop.xlane.xlu0 %1203 }
 0x79d   :  { %3651 = vrsqrt.f32 %v1207_v14  ;;  %v1206_v19 = vmul.f32 0.03125, %v1204_v17 }
 0x79f   :  { %v1208_v29 = vadd.f32 1e-05, %v1206_v19  ;;  %v3023_v19 = vld [vmem:[%s4448_s15] ss:$0 sm:$0xff] }
 0x7a1   :  { %3653 = vrsqrt.f32 %v1208_v29 }
 0x7aa   :  { %v3652_v31 = vpop.eup %3651 }
 0x7ab   :  { %v1211_v32 = vmul.f32 %v3652_v31, %v1195_v18 }
 0x7ad   :  { %v1220_v36 = vmul.f32 %v3011_v33, %v1211_v32 }
 0x7ae   :  { %v3654_v34 = vpop.eup %3653 }
 0x7af   :  { %v1212_v35 = vmul.f32 %v3654_v34, %v1196_v5  ;;  %v1229_v39 = vadd.f32 %v3012_v37, %v1220_v36  ;;  %v3599_v5 = vld [vmem:[%s4482_s25 + $0x18] sm:$0xff]  }
 0x7b1   :  { %v1221_v38 = vmul.f32 %v3011_v33, %v1212_v35  ;;  %v3024_v33 = vld [vmem:[%s4449_s16] ss:$0 sm:$0xff] }
 0x7b3   :  { %v1230_v40 = vadd.f32 %v3012_v37, %v1221_v38  ;;  %v3602_v37 = vld [vmem:[%s4480_s3 + $0x18] sm:$0xff]  }
 0x7b4   :  { %v3603_v38 = vld [vmem:[%s4484_s2 + $0x18] sm:$0xff]  }
 0x7b5   :  { %v1231_v41 = vpack.c.bf16 %v1230_v40, %v1229_v39 }
 0x7b7   :  { %3366 = vmatmul.mubr.msk.bf16.vlgmr.msra.gmra.mxu0 %vm113_vm1, %v1231_v41  ;;  %v3605_v41 = vld [vmem:[%s4484_s2 + $0x10] sm:$0xff]  }
 0x7b8   :  { %3385 = vmatprep.mubr.msk.bf16.mxu0 %vm3700_vm0, %v3699_v0  ;;  %3382 = vmatpush3.bf16.msra.mxu0 %v3598_v15 }
 0x7b9   :  { %3383 = vmatprep.subr.bf16.mxu0 %v3699_v0 }
 0x7bc   :  { %3384 = vmatpush3.bf16.msra.mxu0 %v3600_v22 }
 0x7bd   :  { %3389 = vmatprep.subr.bf16.mxu0 %v3699_v0 }
 0x877   :  { %v1292_v46 = vpop.f32.mrf.mxu0 }
 0x878   :  { %v1293_v48 = vadd.f32 %v3013_v45, %v1292_v46 }
 0x879   :  { %v3367_v47 = vpop.f32.mrf.mxu0 }
 0x87a   :  { %v1299_v52 = vmax.f32 %v1293_v48, 0.0 }
 0x87b   :  { %v1295_v49 = vpop.f32.mrf.mxu0 }
 0x87c   :  { %v1296_v50 = vadd.f32 %v3013_v45, %v1295_v49 }
 0x87d   :  { %v3368_v51 = vpop.f32.mrf.mxu0 }
 0x87e   :  { %v1300_v53 = vmax.f32 %v1296_v50, 0.0 }
 0x880   :  { %v1301_v54 = vpack.c.bf16 %v1300_v53, %v1299_v52 }
 0x882   :  { %3378 = vmatmul.mubr.msk.bf16.vlgmr.msra.gmra.mxu1 %vm1341_vm11, %v1301_v54 }
 0x883   :  { %3401 = vmatprep.mubr.msk.bf16.mxu1 %vm3700_vm0, %v3699_v0  ;;  %3398 = vmatpush3.bf16.msra.mxu1 %v3599_v5 }
 0x884   :  { %3399 = vmatprep.subr.bf16.mxu1 %v3699_v0 }
 0x887   :  { %3400 = vmatpush3.bf16.msra.mxu1 %v3601_v23 }
 0x888   :  { %3413 = vmatprep.subr.bf16.mxu1 %v3699_v0 }
 0x942   :  { %v1379_v56 = vpop.f32.mrf.mxu1 }
 0x943   :  { %v1380_v28 = vadd.f32 %v3017_v55, %v1379_v56 }
 0x944   :  { %v3379_v30 = vpop.f32.mrf.mxu1 }
 0x945   :  { %v1386_v58 = vadd.f32 %v1380_v28, %v1229_v39 }
 0x946   :  { %v1382_v59 = vpop.f32.mrf.mxu1 }
 0x947   :  { %v1383_v60 = vadd.f32 %v3017_v55, %v1382_v59  ;;  %v1388_v61 = vsel %vm113_vm1, %v1386_v58, 0.0 }
 0x948   :  { %1389 = vadd.xlane.f32.xlu1 %v1388_v61  ;;  %v3380_v63 = vpop.f32.mrf.mxu1 }
 0x949   :  { %v1387_v1 = vadd.f32 %v1383_v60, %v1230_v40  ;;  %v3604_v40 = vld [vmem:[%s4480_s3 + $0x10] sm:$0xff]  }
 0x94b   :  { %v1391_v2 = vsel %vm113_vm1, %v1387_v1, 0.0 }
 0x94c   :  { %1392 = vadd.xlane.f32.xlu0 %v1391_v2 }
 0x9d1   :  { %v1390_v3 = vpop.xlane.xlu1 %1389 }
 0x9d2   :  { %v1394_v4 = vmul.f32 0.03125, %v1390_v3 }
 0x9d4   :  { %v1396_v7 = vsub.f32 %v1386_v58, %v1394_v4 }
 0x9d5   :  { %v1393_v8 = vpop.xlane.xlu0 %1392 }
 0x9d6   :  { %v1395_v9 = vmul.f32 0.03125, %v1393_v8  ;;  %v1398_v10 = vmul.f32 %v1396_v7, %v1396_v7 }
 0x9d8   :  { %v1397_v11 = vsub.f32 %v1387_v1, %v1395_v9  ;;  %v1400_v18 = vsel %vm113_vm1, %v1398_v10, 0.0 }
 0x9d9   :  { %1401 = vadd.xlane.f32.xlu1 %v1400_v18 }
 0x9da   :  { %v1399_v20 = vmul.f32 %v1397_v11, %v1397_v11 }
 0x9dc   :  { %v1403_v21 = vsel %vm113_vm1, %v1399_v20, 0.0 }
 0x9dd   :  { %1404 = vadd.xlane.f32.xlu0 %v1403_v21 }
 0xa62   :  { %v1402_v6 = vpop.xlane.xlu1 %1401 }
 0xa63   :  { %v1406_v16 = vmul.f32 0.03125, %v1402_v6 }
 0xa65   :  { %v1408_v24 = vadd.f32 1e-05, %v1406_v16 }
 0xa66   :  { %v1405_v25 = vpop.xlane.xlu0 %1404 }
 0xa67   :  { %3655 = vrsqrt.f32 %v1408_v24  ;;  %v1407_v26 = vmul.f32 0.03125, %v1405_v25 }
 0xa69   :  { %v1409_v27 = vadd.f32 1e-05, %v1407_v26 }
 0xa6b   :  { %3657 = vrsqrt.f32 %v1409_v27 }
 0xa74   :  { %v3656_v14 = vpop.eup %3655 }
 0xa75   :  { %v1412_v17 = vmul.f32 %v3656_v14, %v1396_v7 }
 0xa77   :  { %v1421_v32 = vmul.f32 %v3023_v19, %v1412_v17 }
 0xa78   :  { %v3658_v29 = vpop.eup %3657 }
 0xa79   :  { %v1413_v31 = vmul.f32 %v3658_v29, %v1397_v11  ;;  %v4147_v35 = vadd.f32 %v3024_v33, %v1421_v32 }
 0xa7b   :  { %v1422_v34 = vmul.f32 %v3023_v19, %v1413_v31 }
 0xa7d   :  { %v4149_v36 = vadd.f32 %v3024_v33, %v1422_v34 }
 0xa7f   :  { %v1432_v39 = vpack.c.bf16 %v4149_v36, %v4147_v35 }
 0xa81   :  { %3386 = vmatmul.mubr.msk.bf16.vlgmr.msra.gmra.mxu0 %vm113_vm1, %v1432_v39  ;;  %3402 = vmatmul.mubr.msk.bf16.vlgmr.msra.gmra.mxu1 %vm113_vm1, %v1432_v39 }
 0xa82   :  { %3390 = vmatpush3.bf16.msra.mxu0 %v3602_v37  ;;  %3414 = vmatpush3.bf16.msra.mxu1 %v3603_v38 }
 0xa83   :  { %3391 = vmatprep.subr.bf16.mxu0 %v3699_v0  ;;  %3415 = vmatprep.subr.bf16.mxu1 %v3699_v0 }
 0xa84   :  { %3393 = vmatprep.mubr.msk.bf16.mxu0 %vm3700_vm0, %v3699_v0  ;;  %3417 = vmatprep.mubr.msk.bf16.mxu1 %vm3700_vm0, %v3699_v0 }
 0xa86   :  { %3392 = vmatpush3.bf16.msra.mxu0 %v3604_v40  ;;  %3416 = vmatpush3.bf16.msra.mxu1 %v3605_v41 }
 0xa87   :  { %3405 = vmatprep.subr.bf16.mxu0 %v3699_v0  ;;  %3427 = vmatprep.subr.bf16.mxu1 %v3699_v0 }
 0xa89   :  { %3394 = vmatmul.mubr.msk.bf16.vlgmr.msra.gmra.mxu0 %vm113_vm1, %v1432_v39  ;;  %3418 = vmatmul.mubr.msk.bf16.vlgmr.msra.gmra.mxu1 %vm113_vm1, %v1432_v39 }
 0xa8a   :  { %3406 = vmatpush3.bf16.msra.mxu0 %v3606_v42  ;;  %3409 = vmatprep.mubr.msk.bf16.mxu0 %vm3700_vm0, %v3699_v0 }
 0xa8b   :  { %3407 = vmatprep.subr.bf16.mxu0 %v3699_v0  ;;  %3429 = vmatprep.mubr.msk.bf16.mxu1 %vm3700_vm0, %v3699_v0 }
 0xa8e   :  { %3408 = vmatpush3.bf16.msra.mxu0 %v3607_v43 }
 0xa8f   :  { %3421 = vmatprep.subr.bf16.mxu0 %v3699_v0 }
 0xa91   :  { %3410 = vmatmul.mubr.msk.bf16.vlgmr.msra.gmra.mxu0 %vm113_vm1, %v1432_v39 }
 0xa92   :  { %3423 = vmatprep.mubr.msk.bf16.mxu0 %vm3700_vm0, %v3699_v0 }
 0xb41   :  { %v1487_v44 = vpop.f32.mrf.mxu0  ;;  %v1605_v45 = vpop.f32.mrf.mxu1 }
 0xb43   :  { %v3387_v46 = vpop.f32.mrf.mxu0  ;;  %v3403_v47 = vpop.f32.mrf.mxu1 }
 0xb45   :  { %v1490_v48 = vpop.f32.mrf.mxu0  ;;  %v1608_v49 = vpop.f32.mrf.mxu1 }
 0xb46   :  { %v1494_v63 = vpack.c.bf16 %v1490_v48, %v1487_v44  ;;  %v1612_v3 = vpack.c.bf16 %v1608_v49, %v1605_v45 }
 0xb47   :  { %v3388_v50 = vpop.f32.mrf.mxu0  ;;  %v3404_v51 = vpop.f32.mrf.mxu1 }
 0xb49   :  { %v1546_v52 = vpop.f32.mrf.mxu0  ;;  %v1723_v53 = vpop.f32.mrf.mxu1 }
 0xb4b   :  { %v3395_v54 = vpop.f32.mrf.mxu0  ;;  %v3419_v55 = vpop.f32.mrf.mxu1 }
 0xb4d   :  { %v1549_v56 = vpop.f32.mrf.mxu0  ;;  %v1726_v28 = vpop.f32.mrf.mxu1 }
 0xb4e   :  { %v1553_v30 = vpack.c.bf16 %v1549_v56, %v1546_v52  ;;  %v1730_v8 = vpack.c.bf16 %v1726_v28, %v1723_v53 }
 0xb4f   :  { %v3396_v58 = vpop.f32.mrf.mxu0  ;;  %v3420_v59 = vpop.f32.mrf.mxu1 }
 0xb50   :  { %1898 = vrot.lane.b32.xlu1 %v1553_v30, %s3701_s4  ;;  %v1735_v60 = vsel %vm391_vm2, %v1553_v30, 0 }
 0xb51   :  { %v1664_v61 = vpop.f32.mrf.mxu0  ;;  %3422 = vmatpush3.bf16.xpose.msra.mxu0 %v1735_v60 }
 0xb52   :  { %3433 = vmatprep.subr.bf16.mxu0 %v3699_v0 }
 0xb53   :  { %v3411_v1 = vpop.f32.mrf.mxu0 }
 0xb54   :  { %1895 = vrot.lane.b32.xlu1 %v1494_v63, %s3701_s4 }
 0xb55   :  { %v1667_v2 = vpop.f32.mrf.mxu0 }
 0xb56   :  { %v1671_v4 = vpack.c.bf16 %v1667_v2, %v1664_v61 }
 0xb57   :  { %v3412_v7 = vpop.f32.mrf.mxu0 }
 0xb58   :  { %1948 = vrot.lane.b32.xlu1 %v1612_v3, %s3701_s4  ;;  %3424 = vmatmul.mubr.msk.bf16.vlgmr.msra.gmra.mxu0 %vm391_vm2, %v1494_v63  ;;  %v1782_v9 = vsel %vm391_vm2, %v1671_v4, 0 }
 0xb59   :  { %1951 = vrot.lane.b32.xlu0 %v1671_v4, %s3701_s4  ;;  %3428 = vmatpush3.bf16.xpose.msra.mxu1 %v1782_v9 }
 0xb5a   :  { %3434 = vmatpush3.bf16.msra.mxu0 %v1730_v8  ;;  %3439 = vmatprep.subr.bf16.mxu1 %v3699_v0 }
 0xb5b   :  { %3435 = vmatprep.mubr.msk.bf16.mxu0 %vm3700_vm0, %v3699_v0  ;;  %3445 = vmatprep.subr.bf16.mxu0 %v3699_v0 }
 0xb5c   :  { %2075 = vrot.lane.b32.xlu1 %v1553_v30, %s4491_s0 }
 0xb5d   :  { %2020 = vrot.lane.b32.xlu0 %v1730_v8, %s3701_s4  ;;  %s4493_s4 = smov 16  }
 0xb60   :  { %2073 = vrot.lane.b32.xlu1 %v1494_v63, %s4491_s0  ;;  %3430 = vmatmul.mubr.msk.bf16.vlgmr.msra.gmra.mxu1 %vm391_vm2, %v1612_v3 }
 0xb61   :  { %2126 = vrot.lane.b32.xlu0 %v1671_v4, %s4491_s0  ;;  %3441 = vmatprep.mubr.msk.bf16.mxu1 %vm3700_vm0, %v3699_v0 }
 0xb64   :  { %2194 = vrot.lane.b32.xlu1 %v1730_v8, %s4491_s0 }
 0xb65   :  { %2124 = vrot.lane.b32.xlu0 %v1612_v3, %s4491_s0 }
 0xb68   :  { %2300 = vrot.lane.b32.xlu1 %v1671_v4, %s4492_s28 }
 0xb69   :  { %2249 = vrot.lane.b32.xlu0 %v1553_v30, %s4492_s28 }
 0xb6c   :  { %2298 = vrot.lane.b32.xlu1 %v1612_v3, %s4492_s28 }
 0xb6d   :  { %2247 = vrot.lane.b32.xlu0 %v1494_v63, %s4492_s28 }
 0xb71   :  { %2368 = vrot.lane.b32.xlu0 %v1730_v8, %s4492_s28 }
 0xbc2   :  { %v1899_v10 = vpop.permute.xlu1 %1898 }
 0xbc3   :  { %v1904_v11 = vsel %vm391_vm2, %v1899_v10, 0 }
 0xbc4   :  { %3440 = vmatpush3.bf16.xpose.msra.mxu1 %v1904_v11 }
 0xbc5   :  { %3451 = vmatprep.subr.bf16.mxu1 %v3699_v0 }
 0xbc6   :  { %v1896_v18 = vpop.permute.xlu1 %1895 }
 0xbca   :  { %v1949_v37 = vpop.permute.xlu1 %1948 }
 0xbcb   :  { %v1952_v20 = vpop.permute.xlu0 %1951  ;;  %3442 = vmatmul.mubr.msk.bf16.vlgmr.msra.gmra.mxu1 %vm391_vm2, %v1896_v18 }
 0xbcc   :  { %3453 = vmatprep.mubr.msk.bf16.mxu1 %vm3700_vm0, %v3699_v0  ;;  %v1957_v39 = vsel %vm391_vm2, %v1952_v20, 0 }
 0xbce   :  { %v2076_v40 = vpop.permute.xlu1 %2075 }
 0xbcf   :  { %v2021_v21 = vpop.permute.xlu0 %2020  ;;  %v2081_v41 = vsel %vm391_vm2, %v2076_v40, 0 }
 0xbd0   :  { %3452 = vmatpush3.bf16.msra.mxu1 %v2021_v21 }
 0xbd1   :  { %3463 = vmatprep.subr.bf16.mxu1 %v3699_v0 }
 0xbd2   :  { %v2074_v42 = vpop.permute.xlu1 %2073 }
 0xbd3   :  { %v2127_v4 = vpop.permute.xlu0 %2126 }
 0xbd4   :  { %v2132_v21 = vsel %vm391_vm2, %v2127_v4, 0 }
 0xbd6   :  { %v2195_v43 = vpop.permute.xlu1 %2194 }
 0xbd7   :  { %v2125_v11 = vpop.permute.xlu0 %2124 }
 0xc18   :  { %v1771_v15 = vpop.f32.mrf.mxu0 }
 0xc1a   :  { %v3425_v5 = vpop.f32.mrf.mxu0 }
 0xc1c   :  { %v1774_v22 = vpop.f32.mrf.mxu0 }
 0xc1e   :  { %v3426_v23 = vpop.f32.mrf.mxu0 }
 0xc20   :  { %v1818_v6 = vpop.f32.mrf.mxu1 }
 0xc21   :  { %v1825_v16 = vsel %vm3937_vm5, %v1771_v15, %v1818_v6  ;;  %v2250_v15 = vpop.permute.xlu0 %2249  ;;  %v2301_v6 = vpop.permute.xlu1 %2300 }
 0xc22   :  { %v3062_v24 = vclamps-f32 %v1825_v16, 5.0  ;;  %v3431_v25 = vpop.f32.mrf.mxu1  ;;  %v2255_v5 = vsel %vm391_vm2, %v2250_v15, 0 }
 0xc24   :  { %v1831_v26 = vmul.f32 1.442695, %v3062_v24  ;;  %v1821_v27 = vpop.f32.mrf.mxu1 }
 0xc25   :  { %v1826_v14 = vsel %vm3944_vm8, %v1774_v22, %v1821_v27  ;;  %v2248_v22 = vpop.permute.xlu0 %2247  ;;  %v2299_v16 = vpop.permute.xlu1 %2298 }
 0xc26   :  { %v3063_v17 = vclamps-f32 %v1826_v14, 5.0  ;;  %v3432_v19 = vpop.f32.mrf.mxu1  ;;  %3659 = vpow2.f32 %v1831_v26 }
 0xc28   :  { %v1833_v29 = vmul.f32 1.442695, %v3063_v17 }
 0xc29   :  { %v2369_v23 = vpop.permute.xlu0 %2368 }
 0xc2a   :  { %3661 = vpow2.f32 %v1833_v29 }
 0xc33   :  { %v3660_v31 = vpop.eup %3659 }
 0xc34   :  { %v4229_v33 = vmul.f32 %v3660_v31, %v3955_v12 }
 0xc36   :  { %v1837_v62 = vsel %vm498_vm9, %v4229_v33, 0.0 }
 0xc37   :  { %v3662_v32 = vpop.eup %3661 }
 0xc38   :  { %v4232_v34 = vmul.f32 %v3662_v32, %v3958_v13 }
 0xc3a   :  { %v1843_v38 = vpack.c.bf16 %v4232_v34, %v4229_v33 }
 0xc3c   :  { %3436 = vmatmul.mubr.msk.bf16.vlgmr.msra.gmra.mxu0 %vm498_vm9, %v1843_v38 }
 0xc3d   :  { %3446 = vmatpush3.bf16.xpose.msra.mxu0 %v1957_v39  ;;  %3447 = vmatprep.mubr.msk.bf16.mxu0 %vm3700_vm0, %v3699_v0 }
 0xc3e   :  { %3457 = vmatprep.subr.bf16.mxu0 %v3699_v0 }
 0xc44   :  { %3448 = vmatmul.mubr.msk.bf16.vlgmr.msra.gmra.mxu0 %vm391_vm2, %v1949_v37 }
 0xc45   :  { %3458 = vmatpush3.bf16.xpose.msra.mxu0 %v2081_v41  ;;  %3459 = vmatprep.mubr.msk.bf16.mxu0 %vm3700_vm0, %v3699_v0 }
 0xc46   :  { %3469 = vmatprep.subr.bf16.mxu0 %v3699_v0 }
 0xc4c   :  { %3460 = vmatmul.mubr.msk.bf16.vlgmr.msra.gmra.mxu0 %vm391_vm2, %v2074_v42 }
 0xc4d   :  { %3470 = vmatpush3.bf16.msra.mxu0 %v2195_v43  ;;  %3471 = vmatprep.mubr.msk.bf16.mxu0 %vm3700_vm0, %v3699_v0 }
 0xc4e   :  { %3481 = vmatprep.subr.bf16.mxu0 %v3699_v0 }
 0xc8b   :  { %v1940_v44 = vpop.f32.mrf.mxu1 }
 0xc8d   :  { %v3443_v45 = vpop.f32.mrf.mxu1 }
 0xc8f   :  { %v1943_v46 = vpop.f32.mrf.mxu1 }
 0xc91   :  { %v3444_v47 = vpop.f32.mrf.mxu1 }
 0xcfc   :  { %v4250_v48 = vpop.f32.mrf.mxu0 }
 0xcfe   :  { %v3437_v49 = vpop.f32.mrf.mxu0 }
 0xd00   :  { %v4252_v50 = vpop.f32.mrf.mxu0 }
 0xd02   :  { %v3438_v51 = vpop.f32.mrf.mxu0 }
 0xd04   :  { %v1993_v52 = vpop.f32.mrf.mxu0 }
 0xd05   :  { %v2000_v53 = vsel %vm3937_vm5, %v1940_v44, %v1993_v52 }
 0xd06   :  { %v3067_v54 = vclamps-f32 %v2000_v53, 5.0  ;;  %v3449_v55 = vpop.f32.mrf.mxu0 }
 0xd08   :  { %v2006_v56 = vmul.f32 1.442695, %v3067_v54  ;;  %v1996_v28 = vpop.f32.mrf.mxu0 }
 0xd09   :  { %v2001_v30 = vsel %vm3944_vm8, %v1943_v46, %v1996_v28 }
 0xd0a   :  { %3663 = vpow2.f32 %v2006_v56  ;;  %v3068_v58 = vclamps-f32 %v2001_v30, 5.0  ;;  %v3450_v59 = vpop.f32.mrf.mxu0 }
 0xd0c   :  { %v2008_v60 = vmul.f32 1.442695, %v3068_v58  ;;  %v2117_v61 = vpop.f32.mrf.mxu0 }
 0xd0e   :  { %3665 = vpow2.f32 %v2008_v60  ;;  %v3461_v63 = vpop.f32.mrf.mxu0 }
 0xd0f   :  { %v2306_v63 = vsel %vm391_vm2, %v2301_v6, 0 }
 0xd10   :  { %v2120_v1 = vpop.f32.mrf.mxu0 }
 0xd12   :  { %v3462_v2 = vpop.f32.mrf.mxu0 }
 0xd17   :  { %v3664_v3 = vpop.eup %3663 }
 0xd18   :  { %v2010_v7 = vmul.f32 %v3664_v3, %v3955_v12 }
 0xd1a   :  { %v2012_v8 = vsel %vm498_vm9, %v2010_v7, 0.0 }
 0xd1b   :  { %v3666_v9 = vpop.eup %3665  ;;  %2013 = vadd.xlane.f32.xlu1 %v2012_v8 }
 0xd1c   :  { %v2011_v10 = vmul.f32 %v3666_v9, %v3958_v13 }
 0xd1e   :  { %v2015_v18 = vsel %vm498_vm9, %v2011_v10, 0.0  ;;  %v2018_v20 = vpack.c.bf16 %v2011_v10, %v2010_v7 }
 0xd1f   :  { %2016 = vadd.xlane.f32.xlu0 %v2015_v18 }
 0xd20   :  { %3454 = vmatmul.mubr.msk.bf16.vlgmr.msra.gmra.mxu1 %vm498_vm9, %v2018_v20 }
 0xd21   :  { %3464 = vmatpush3.bf16.xpose.msra.mxu1 %v2132_v21  ;;  %3465 = vmatprep.mubr.msk.bf16.mxu1 %vm3700_vm0, %v3699_v0 }
 0xd22   :  { %3475 = vmatprep.subr.bf16.mxu1 %v3699_v0 }
 0xd28   :  { %3466 = vmatmul.mubr.msk.bf16.vlgmr.msra.gmra.mxu1 %vm391_vm2, %v2125_v11 }
 0xd29   :  { %3476 = vmatpush3.bf16.xpose.msra.mxu1 %v2255_v5  ;;  %3477 = vmatprep.mubr.msk.bf16.mxu1 %vm3700_vm0, %v3699_v0 }
 0xd2a   :  { %3487 = vmatprep.subr.bf16.mxu1 %v3699_v0 }
 0xd30   :  { %3478 = vmatmul.mubr.msk.bf16.vlgmr.msra.gmra.mxu1 %vm391_vm2, %v2248_v22 }
 0xd31   :  { %3488 = vmatpush3.bf16.msra.mxu1 %v2369_v23  ;;  %3489 = vmatprep.mubr.msk.bf16.mxu1 %vm3700_vm0, %v3699_v0 }
 0xd32   :  { %3501 = vmatprep.subr.bf16.mxu1 %v3699_v0 }
 0xda4   :  { %v2014_v24 = vpop.xlane.xlu1 %2013 }
 0xda5   :  { %v2067_v26 = vadd.f32 1e-06, %v2014_v24 }
 0xda7   :  { %3667 = vrcp.f32 %v2067_v26 }
 0xda8   :  { %v2017_v25 = vpop.xlane.xlu0 %2016 }
 0xda9   :  { %v2068_v27 = vadd.f32 1e-06, %v2017_v25 }
 0xdab   :  { %3669 = vrcp.f32 %v2068_v27 }
 0xdb4   :  { %v3668_v19 = vpop.eup %3667 }
 0xdb8   :  { %v3670_v29 = vpop.eup %3669 }
 0xde0   :  { %v2060_v14 = vpop.f32.mrf.mxu1 }
 0xde1   :  { %v4276_v32 = vmul.f32 %v3668_v19, %v2060_v14 }
 0xde2   :  { %v3455_v17 = vpop.f32.mrf.mxu1 }
 0xde4   :  { %v2063_v31 = vpop.f32.mrf.mxu1 }
 0xde5   :  { %v4278_v37 = vmul.f32 %v3670_v29, %v2063_v31 }
 0xde6   :  { %v3456_v38 = vpop.f32.mrf.mxu1 }
 0xde7   :  { %v3565_v39 = vpack.i.bf16 %v4278_v37, %v4276_v32  ;;  %v3608_v38 = vld [vmem:[%s4490_s27 + $0x18] sm:$0xff]  }
 0xde8   :  { %v2168_v40 = vpop.f32.mrf.mxu1 }
 0xde9   :  { %v2175_v41 = vsel %vm3937_vm5, %v2117_v61, %v2168_v40 }
 0xdea   :  { %v3072_v42 = vclamps-f32 %v2175_v41, 5.0  ;;  %v3467_v43 = vpop.f32.mrf.mxu1 }
 0xdeb   :  { %v3609_v43 = vld [vmem:[%s4490_s27 + $0x10] sm:$0xff]  }
 0xdec   :  { %v2181_v44 = vmul.f32 1.442695, %v3072_v42  ;;  %v2171_v45 = vpop.f32.mrf.mxu1 }
 0xded   :  { %v2176_v46 = vsel %vm3944_vm8, %v2120_v1, %v2171_v45 }
 0xdee   :  { %3671 = vpow2.f32 %v2181_v44  ;;  %v3073_v47 = vclamps-f32 %v2176_v46, 5.0  ;;  %v3468_v49 = vpop.f32.mrf.mxu1 }
 0xdf0   :  { %v2183_v51 = vmul.f32 1.442695, %v3073_v47  ;;  %v2291_v52 = vpop.f32.mrf.mxu1 }
 0xdf2   :  { %3673 = vpow2.f32 %v2183_v51  ;;  %v3479_v53 = vpop.f32.mrf.mxu1 }
 0xdf4   :  { %v2294_v54 = vpop.f32.mrf.mxu1 }
 0xdf6   :  { %v3480_v55 = vpop.f32.mrf.mxu1 }
 0xdfb   :  { %v3672_v56 = vpop.eup %3671 }
 0xdfc   :  { %v2185_v28 = vmul.f32 %v3672_v56, %v3955_v12 }
 0xdfe   :  { %v2187_v30 = vsel %vm498_vm9, %v2185_v28, 0.0 }
 0xdff   :  { %v3674_v58 = vpop.eup %3673  ;;  %2188 = vadd.xlane.f32.xlu0 %v2187_v30 }
 0xe00   :  { %v2186_v59 = vmul.f32 %v3674_v58, %v3958_v13 }
 0xe02   :  { %v2190_v60 = vsel %vm498_vm9, %v2186_v59, 0.0  ;;  %v2193_v61 = vpack.c.bf16 %v2186_v59, %v2185_v28 }
 0xe03   :  { %2191 = vadd.xlane.f32.xlu1 %v2190_v60 }
 0xe04   :  { %3472 = vmatmul.mubr.msk.bf16.vlgmr.msra.gmra.mxu0 %vm498_vm9, %v2193_v61 }
 0xe05   :  { %3482 = vmatpush3.bf16.xpose.msra.mxu0 %v2306_v63  ;;  %3483 = vmatprep.mubr.msk.bf16.mxu0 %vm3700_vm0, %v3699_v0 }
 0xe06   :  { %3493 = vmatprep.subr.bf16.mxu0 %v3699_v0 }
 0xe0c   :  { %3484 = vmatmul.mubr.msk.bf16.vlgmr.msra.gmra.mxu0 %vm391_vm2, %v2299_v16 }
 0xe0d   :  { %3497 = vmatprep.mubr.msk.bf16.mxu0 %vm3700_vm0, %v3699_v0  ;;  %3494 = vmatpush3.bf16.msra.mxu0 %v3608_v38 }
 0xe0e   :  { %3495 = vmatprep.subr.bf16.mxu0 %v3699_v0 }
 0xe11   :  { %3496 = vmatpush3.bf16.msra.mxu0 %v3609_v43 }
 0xe12   :  { %3509 = vmatprep.subr.bf16.mxu0 %v3699_v0 }
 0xe88   :  { %v2189_v24 = vpop.xlane.xlu0 %2188 }
 0xe89   :  { %v2241_v27 = vadd.f32 1e-06, %v2189_v24 }
 0xe8c   :  { %v2192_v6 = vpop.xlane.xlu1 %2191 }
 0xe8d   :  { %v2242_v25 = vadd.f32 1e-06, %v2192_v6 }
 0xec4   :  { %v2234_v1 = vpop.f32.mrf.mxu0 }
 0xec6   :  { %v3473_v2 = vpop.f32.mrf.mxu0 }
 0xec8   :  { %v2237_v3 = vpop.f32.mrf.mxu0 }
 0xeca   :  { %v3474_v4 = vpop.f32.mrf.mxu0 }
 0xecc   :  { %v2342_v7 = vpop.f32.mrf.mxu0 }
 0xecd   :  { %v2349_v8 = vsel %vm3937_vm5, %v2291_v52, %v2342_v7 }
 0xece   :  { %v3077_v9 = vclamps-f32 %v2349_v8, 5.0  ;;  %v3485_v10 = vpop.f32.mrf.mxu0 }
 0xed0   :  { %v2355_v11 = vmul.f32 1.442695, %v3077_v9  ;;  %v2345_v18 = vpop.f32.mrf.mxu0 }
 0xed1   :  { %v2350_v20 = vsel %vm3944_vm8, %v2294_v54, %v2345_v18 }
 0xed2   :  { %3675 = vpow2.f32 %v2355_v11  ;;  %v3078_v21 = vclamps-f32 %v2350_v20, 5.0  ;;  %v3486_v15 = vpop.f32.mrf.mxu0 }
 0xed4   :  { %v2357_v5 = vmul.f32 1.442695, %v3078_v21  ;;  %v3088_v21 = vld [vmem:[%s4441_s8 + $0x1] ss:$0 sm:$0xff] }
 0xed6   :  { %3677 = vpow2.f32 %v2357_v5 }
 0xed7   :  { %3679 = vrcp.f32 %v2242_v25 }
 0xed8   :  { %3681 = vrcp.f32 %v2241_v27 }
 0xedf   :  { %v3676_v22 = vpop.eup %3675 }
 0xee0   :  { %v2359_v23 = vmul.f32 %v3676_v22, %v3955_v12  ;;  %v1840_v12 = vsel %vm498_vm9, %v4232_v34, 0.0 }
 0xee2   :  { %v2361_v16 = vsel %vm498_vm9, %v2359_v23, 0.0 }
 0xee3   :  { %v3678_v57 = vpop.eup %3677  ;;  %2362 = vadd.xlane.f32.xlu0 %v2361_v16 }
 0xee4   :  { %v2360_v26 = vmul.f32 %v3678_v57, %v3958_v13  ;;  %v3680_v13 = vpop.eup %3679 }
 0xee5   :  { %v2246_v19 = vmul.f32 %v3680_v13, %v2237_v3  ;;  %v3682_v29 = vpop.eup %3681 }
 0xee6   :  { %v2364_v14 = vsel %vm498_vm9, %v2360_v26, 0.0  ;;  %v2367_v17 = vpack.c.bf16 %v2360_v26, %v2359_v23  ;;  %v2245_v33 = vmul.f32 %v3682_v29, %v2234_v1  ;;  %v3610_v29 = vld [vmem:[%s4442_s11 + $0x18] sm:$0xff]  }
 0xee7   :  { %1838 = vadd.xlane.f32.xlu0 %v1837_v62  ;;  %2365 = vadd.xlane.f32.xlu1 %v2364_v14 }
 0xee8   :  { %3490 = vmatmul.mubr.msk.bf16.vlgmr.msra.gmra.mxu1 %vm498_vm9, %v2367_v17  ;;  %v3570_v31 = vpack.i.bf16 %v2246_v19, %v2245_v33  ;;  %v3611_v33 = vld [vmem:[%s4442_s11 + $0x10] sm:$0xff]  }
 0xee9   :  { %3505 = vmatprep.mubr.msk.bf16.mxu1 %vm3700_vm0, %v3699_v0  ;;  %3502 = vmatpush3.bf16.msra.mxu1 %v3610_v29 }
 0xeea   :  { %3503 = vmatprep.subr.bf16.mxu1 %v3699_v0 }
 0xeeb   :  { %1841 = vadd.xlane.f32.xlu1 %v1840_v12 }
 0xeed   :  { %3504 = vmatpush3.bf16.msra.mxu1 %v3611_v33  ;;  %v3118_v33 = vld [vmem:[%s4448_s15 + $0x1] ss:$0 sm:$0xff] }
 0xeee   :  { %3521 = vmatprep.subr.bf16.mxu1 %v3699_v0 }
 0xefc   :  { %3571 = vrot.lane.b32.xlu1 %v3570_v31, %s4493_s4  ;;  %v3612_v31 = vld [vmem:[%s4443_s13 + $0x38] sm:$0xff]  }
 0xefd   :  { %3566 = vrot.lane.b32.xlu0 %v3565_v39, %s4494_s29 }
 0xf6c   :  { %v2363_v34 = vpop.xlane.xlu0 %2362 }
 0xf6d   :  { %v2415_v41 = vadd.f32 1e-06, %v2363_v34 }
 0xf6f   :  { %3683 = vrcp.f32 %v2415_v41 }
 0xf70   :  { %v2366_v40 = vpop.xlane.xlu1 %2365  ;;  %v1839_v52 = vpop.xlane.xlu0 %1838 }
 0xf71   :  { %v2416_v42 = vadd.f32 1e-06, %v2366_v40  ;;  %v1888_v54 = vadd.f32 1e-06, %v1839_v52 }
 0xf73   :  { %3685 = vrcp.f32 %v2416_v42 }
 0xf74   :  { %v1842_v53 = vpop.xlane.xlu1 %1841  ;;  %3687 = vrcp.f32 %v1888_v54  ;;  %v3567_v30 = vpop.permute.xlu0 %3566  ;;  %v3613_v54 = vld [vmem:[%s4443_s13 + $0x30] sm:$0xff]  }
 0xf75   :  { %v1889_v55 = vadd.f32 1e-06, %v1842_v53  ;;  %v3569_v61 = vunpack.i.h.bf16 %v3567_v30  ;;  %v3568_v63 = vunpack.i.l.bf16 %v3567_v30 }
 0xf77   :  { %3689 = vrcp.f32 %v1889_v55  ;;  %v3614_v55 = vld [vmem:[%s4443_s13 + $0x28] sm:$0xff]  }
 0xf78   :  { %v3572_v60 = vpop.permute.xlu1 %3571 }
 0xf79   :  { %v3574_v3 = vunpack.i.h.bf16 %v3572_v60  ;;  %v3573_v4 = vunpack.i.l.bf16 %v3572_v60 }
 0xf7c   :  { %v3684_v39 = vpop.eup %3683 }
 0xf80   :  { %v3686_v44 = vpop.eup %3685 }
 0xf81   :  { %v3688_v56 = vpop.eup %3687 }
 0xf82   :  { %v1892_v58 = vmul.f32 %v3688_v56, %v4250_v48  ;;  %v3615_v56 = vld [vmem:[%s4443_s13 + $0x20] sm:$0xff]  }
 0xf84   :  { %v3690_v28 = vpop.eup %3689  ;;  %v2445_v1 = vsel %vm391_vm2, %v1892_v58, %v3568_v63 }
 0xf85   :  { %v1893_v59 = vmul.f32 %v3690_v28, %v4252_v50  ;;  %v2447_v11 = vsel %vm498_vm9, %v2445_v1, %v3573_v4  ;;  %v3098_v28 = vld [vmem:[%s4446_s12 + $0x1] ss:$0 sm:$0xff] }
 0xf86   :  { %v3111_v4 = vld [vmem:[%s4447_s14 + $0x1] ss:$0 sm:$0xff] }
 0xf87   :  { %v2446_v2 = vsel %vm391_vm2, %v1893_v59, %v3569_v61 }
 0xf88   :  { %v2448_v10 = vsel %vm498_vm9, %v2446_v2, %v3574_v3 }
 0xfa8   :  { %v2408_v32 = vpop.f32.mrf.mxu1 }
 0xfa9   :  { %v2419_v46 = vmul.f32 %v3684_v39, %v2408_v32  ;;  %v3090_v39 = vld [vmem:[%s4444_s9 + $0x1] ss:$0 sm:$0xff] }
 0xfaa   :  { %v3491_v37 = vpop.f32.mrf.mxu1 }
 0xfac   :  { %v2411_v45 = vpop.f32.mrf.mxu1 }
 0xfad   :  { %v2420_v47 = vmul.f32 %v3686_v44, %v2411_v45 }
 0xfae   :  { %v3492_v49 = vpop.f32.mrf.mxu1 }
 0xfaf   :  { %v3575_v51 = vpack.i.bf16 %v2420_v47, %v2419_v46  ;;  %v3092_v47 = vld [vmem:[%s4445_s10 + $0x1] ss:$0 sm:$0xff] }
 0xfb1   :  { %3576 = vrot.lane.b32.xlu1 %v3575_v51, %s4495_s24 }
0x1023   :  { %v3577_v7 = vpop.permute.xlu1 %3576 }
0x1024   :  { %v3579_v8 = vunpack.i.h.bf16 %v3577_v7  ;;  %v3578_v9 = vunpack.i.l.bf16 %v3577_v7 }
0x1026   :  { %v2449_v48 = vsel %vm1111_vm10, %v2447_v11, %v3578_v9  ;;  %v2450_v50 = vsel %vm1111_vm10, %v2448_v10, %v3579_v8 }
0x1027   :  { %v2451_v18 = vpack.c.bf16 %v2450_v50, %v2449_v48 }
0x1029   :  { %3498 = vmatmul.mubr.msk.bf16.vlgmr.msra.gmra.mxu0 %vm113_vm1, %v2451_v18 }
0x102a   :  { %3517 = vmatprep.mubr.msk.bf16.mxu0 %vm3700_vm0, %v3699_v0  ;;  %3510 = vmatpush3.bf16.msra.mxu0 %v3612_v31 }
0x102b   :  { %3511 = vmatprep.subr.bf16.mxu0 %v3699_v0 }
0x102e   :  { %3512 = vmatpush3.bf16.msra.mxu0 %v3613_v54 }
0x102f   :  { %3513 = vmatprep.subr.bf16.mxu0 %v3699_v0 }
0x1032   :  { %3514 = vmatpush3.bf16.msra.mxu0 %v3614_v55 }
0x1033   :  { %3515 = vmatprep.subr.bf16.mxu0 %v3699_v0 }
0x1036   :  { %3516 = vmatpush3.bf16.msra.mxu0 %v3615_v56  ;;  %v3125_v56 = vld [vmem:[%s4454_s20] ss:$0 sm:$0xff] }
0x1037   :  { %3535 = vmatprep.subr.bf16.mxu0 %v3699_v0 }
0x10e9   :  { %v2506_v20 = vpop.f32.mrf.mxu0 }
0x10ea   :  { %v2513_v15 = vadd.f32 %v2506_v20, %v4147_v35 }
0x10eb   :  { %v3499_v5 = vpop.f32.mrf.mxu0 }
0x10ec   :  { %v2523_v22 = vadd.f32 %v3088_v21, %v2513_v15 }
0x10ed   :  { %v2509_v23 = vpop.f32.mrf.mxu0 }
0x10ee   :  { %v2514_v6 = vadd.f32 %v2509_v23, %v4149_v36  ;;  %v2525_v16 = vsel %vm113_vm1, %v2523_v22, 0.0 }
0x10ef   :  { %2526 = vadd.xlane.f32.xlu0 %v2525_v16  ;;  %v3500_v57 = vpop.f32.mrf.mxu0 }
0x10f0   :  { %v2524_v24 = vadd.f32 %v3088_v21, %v2514_v6 }
0x10f2   :  { %v2528_v25 = vsel %vm113_vm1, %v2524_v24, 0.0 }
0x10f3   :  { %2529 = vadd.xlane.f32.xlu1 %v2528_v25 }
0x1178   :  { %v2527_v26 = vpop.xlane.xlu0 %2526 }
0x1179   :  { %v2531_v27 = vmul.f32 0.03125, %v2527_v26 }
0x117b   :  { %v2533_v62 = vsub.f32 %v2523_v22, %v2531_v27  ;;  %v3616_v27 = vld [vmem:[%s4450_s17 + $0x8] sm:$0xff]  }
0x117c   :  { %v2530_v14 = vpop.xlane.xlu1 %2529 }
0x117d   :  { %v2532_v17 = vmul.f32 0.03125, %v2530_v14  ;;  %v2535_v12 = vmul.f32 %v2533_v62, %v2533_v62 }
0x117f   :  { %v2534_v35 = vsub.f32 %v2524_v24, %v2532_v17  ;;  %v2537_v13 = vsel %vm113_vm1, %v2535_v12, 0.0 }
0x1180   :  { %2538 = vadd.xlane.f32.xlu0 %v2537_v13 }
0x1181   :  { %v2536_v19 = vmul.f32 %v2534_v35, %v2534_v35 }
0x1183   :  { %v2540_v36 = vsel %vm113_vm1, %v2536_v19, 0.0 }
0x1184   :  { %2541 = vadd.xlane.f32.xlu0 %v2540_v36 }
0x1209   :  { %v2539_v38 = vpop.xlane.xlu0 %2538 }
0x120a   :  { %v2543_v34 = vmul.f32 0.03125, %v2539_v38 }
0x120c   :  { %v2545_v40 = vadd.f32 1e-05, %v2543_v34 }
0x120d   :  { %v2542_v41 = vpop.xlane.xlu0 %2541 }
0x120e   :  { %3691 = vrsqrt.f32 %v2545_v40  ;;  %v2544_v42 = vmul.f32 0.03125, %v2542_v41  ;;  %v3120_v40 = vld [vmem:[%s4449_s16 + $0x1] ss:$0 sm:$0xff] }
0x1210   :  { %v2546_v43 = vadd.f32 1e-05, %v2544_v42 }
0x1212   :  { %3693 = vrsqrt.f32 %v2546_v43 }
0x121b   :  { %v3692_v32 = vpop.eup %3691 }
0x121c   :  { %v2549_v37 = vmul.f32 %v3692_v32, %v2533_v62  ;;  %v3617_v62 = vld [vmem:[%s4450_s17] sm:$0xff]  }
0x121e   :  { %v2559_v46 = vmul.f32 %v3090_v39, %v2549_v37  ;;  %v3618_v37 = vld [vmem:[%s4451_s19] sm:$0xff]  }
0x121f   :  { %v3694_v44 = vpop.eup %3693 }
0x1220   :  { %v2550_v45 = vmul.f32 %v3694_v44, %v2534_v35  ;;  %v2569_v51 = vadd.f32 %v3092_v47, %v2559_v46 }
0x1222   :  { %v2560_v49 = vmul.f32 %v3090_v39, %v2550_v45  ;;  %v3121_v39 = vld [vmem:[%s4452_s18] ss:$0 sm:$0xff] }
0x1224   :  { %v2570_v52 = vadd.f32 %v3092_v47, %v2560_v49 }
0x1226   :  { %v2571_v53 = vpack.c.bf16 %v2570_v52, %v2569_v51 }
0x1228   :  { %3506 = vmatmul.mubr.msk.bf16.vlgmr.msra.gmra.mxu1 %vm113_vm1, %v2571_v53 }
0x1229   :  { %3525 = vmatprep.mubr.msk.bf16.mxu1 %vm3700_vm0, %v3699_v0  ;;  %3522 = vmatpush3.bf16.msra.mxu1 %v3616_v27 }
0x122a   :  { %3523 = vmatprep.subr.bf16.mxu1 %v3699_v0 }
0x122d   :  { %3524 = vmatpush3.bf16.msra.mxu1 %v3617_v62 }
0x122e   :  { %3529 = vmatprep.subr.bf16.mxu1 %v3699_v0 }
0x12e8   :  { %v2634_v30 = vpop.f32.mrf.mxu1 }
0x12e9   :  { %v2635_v59 = vadd.f32 %v3098_v28, %v2634_v30 }
0x12ea   :  { %v3507_v58 = vpop.f32.mrf.mxu1 }
0x12eb   :  { %v2641_v1 = vmax.f32 %v2635_v59, 0.0 }
0x12ec   :  { %v2637_v60 = vpop.f32.mrf.mxu1 }
0x12ed   :  { %v2638_v61 = vadd.f32 %v3098_v28, %v2637_v60 }
0x12ee   :  { %v3508_v63 = vpop.f32.mrf.mxu1 }
0x12ef   :  { %v2642_v2 = vmax.f32 %v2638_v61, 0.0 }
0x12f1   :  { %v2643_v3 = vpack.c.bf16 %v2642_v2, %v2641_v1 }
0x12f3   :  { %3518 = vmatmul.mubr.msk.bf16.vlgmr.msra.gmra.mxu0 %vm1341_vm11, %v2643_v3  ;;  %v3128_v3 = vld [vmem:[%s4455_s22] ss:$0 sm:$0xff] }
0x12f4   :  { %3537 = vmatprep.mubr.msk.bf16.mxu0 %vm3700_vm0, %v3699_v0 }
0x13b3   :  { %v2722_v7 = vpop.f32.mrf.mxu0 }
0x13b4   :  { %v2723_v8 = vadd.f32 %v3111_v4, %v2722_v7 }
0x13b5   :  { %v3519_v9 = vpop.f32.mrf.mxu0 }
0x13b6   :  { %v2729_v10 = vadd.f32 %v2723_v8, %v2569_v51 }
0x13b7   :  { %v2725_v11 = vpop.f32.mrf.mxu0 }
0x13b8   :  { %v2726_v48 = vadd.f32 %v3111_v4, %v2725_v11  ;;  %v2731_v50 = vsel %vm113_vm1, %v2729_v10, 0.0 }
0x13b9   :  { %2732 = vadd.xlane.f32.xlu1 %v2731_v50  ;;  %v3520_v18 = vpop.f32.mrf.mxu0 }
0x13ba   :  { %v2730_v20 = vadd.f32 %v2726_v48, %v2570_v52 }
0x13bc   :  { %v2734_v21 = vsel %vm113_vm1, %v2730_v20, 0.0 }
0x13bd   :  { %2735 = vadd.xlane.f32.xlu0 %v2734_v21 }
0x1442   :  { %v2733_v15 = vpop.xlane.xlu1 %2732 }
0x1443   :  { %v2737_v5 = vmul.f32 0.03125, %v2733_v15 }
0x1445   :  { %v2739_v22 = vsub.f32 %v2729_v10, %v2737_v5 }
0x1446   :  { %v2736_v23 = vpop.xlane.xlu0 %2735 }
0x1447   :  { %v2738_v6 = vmul.f32 0.03125, %v2736_v23  ;;  %v2741_v16 = vmul.f32 %v2739_v22, %v2739_v22 }
0x1449   :  { %v2740_v57 = vsub.f32 %v2730_v20, %v2738_v6  ;;  %v2743_v24 = vsel %vm113_vm1, %v2741_v16, 0.0 }
0x144a   :  { %2744 = vadd.xlane.f32.xlu1 %v2743_v24 }
0x144b   :  { %v2742_v25 = vmul.f32 %v2740_v57, %v2740_v57 }
0x144d   :  { %v2746_v26 = vsel %vm113_vm1, %v2742_v25, 0.0 }
0x144e   :  { %2747 = vadd.xlane.f32.xlu0 %v2746_v26 }
0x14d3   :  { %v2745_v14 = vpop.xlane.xlu1 %2744 }
0x14d4   :  { %v2749_v17 = vmul.f32 0.03125, %v2745_v14 }
0x14d6   :  { %v2751_v12 = vadd.f32 1e-05, %v2749_v17 }
0x14d7   :  { %v2748_v35 = vpop.xlane.xlu0 %2747 }
0x14d8   :  { %3695 = vrsqrt.f32 %v2751_v12  ;;  %v2750_v13 = vmul.f32 0.03125, %v2748_v35 }
0x14da   :  { %v2752_v19 = vadd.f32 1e-05, %v2750_v13 }
0x14dc   :  { %3697 = vrsqrt.f32 %v2752_v19 }
0x14e5   :  { %v3696_v36 = vpop.eup %3695 }
0x14e6   :  { %v2755_v29 = vmul.f32 %v3696_v36, %v2739_v22 }
0x14e8   :  { %v2765_v34 = vmul.f32 %v3118_v33, %v2755_v29 }
0x14e9   :  { %v3698_v31 = vpop.eup %3697 }
0x14ea   :  { %v2756_v38 = vmul.f32 %v3698_v31, %v2740_v57  ;;  %v2775_v42 = vadd.f32 %v3120_v40, %v2765_v34 }
0x14ec   :  { %v2766_v41 = vmul.f32 %v3118_v33, %v2756_v38 }
0x14ee   :  { %v2776_v43 = vadd.f32 %v3120_v40, %v2766_v41 }
0x14f0   :  { %v2777_v32 = vpack.c.bf16 %v2776_v43, %v2775_v42 }
0x14f2   :  { %3526 = vmatmul.mubr.msk.bf16.vlgmr.msra.gmra.mxu1 %vm113_vm1, %v2777_v32 }
0x14f3   :  { %3531 = vmatprep.mubr.msk.bf16.mxu1 %vm3700_vm0, %v3699_v0  ;;  %3530 = vmatpush3.bf16.msra.mxu1 %v3618_v37  ;;  %v2910_v0 = vld [vmem:[%s4453_s21] sm:$0xf] }
0x14f4   :  { %v2923_v55 = vsel %vm2921_vm12, %v2910_v0, 0 }
0x14f5   :  { %3536 = vmatpush3.bf16.msra.mxu0 %v2923_v55 }
0x15b2   :  { %v2838_v44 = vpop.f32.mrf.mxu1 }
0x15b3   :  { %v2839_v46 = vadd.f32 %v3121_v39, %v2838_v44 }
0x15b4   :  { %v3527_v45 = vpop.f32.mrf.mxu1 }
0x15b5   :  { %v2845_v52 = vmax.f32 %v2839_v46, 0.0 }
0x15b6   :  { %v2841_v47 = vpop.f32.mrf.mxu1 }
0x15b7   :  { %v2842_v49 = vadd.f32 %v3121_v39, %v2841_v47 }
0x15b8   :  { %v3528_v51 = vpop.f32.mrf.mxu1 }
0x15b9   :  { %v2846_v53 = vmax.f32 %v2842_v49, 0.0 }
0x15bb   :  { %v2847_v54 = vpack.c.bf16 %v2846_v53, %v2845_v52 }
0x15bd   :  { %3532 = vmatmul.mubr.msk.bf16.vlgmr.msra.gmra.mxu1 %vm498_vm9, %v2847_v54 }
0x167d   :  { %v2900_v28 = vpop.f32.mrf.mxu1 }
0x167e   :  { %v2901_v58 = vadd.f32 %v3125_v56, %v2900_v28 }
0x167f   :  { %v3533_v30 = vpop.f32.mrf.mxu1 }
0x1680   :  { %v2907_v63 = vmax.f32 %v2901_v58, 0.0 }
0x1681   :  { %v2903_v59 = vpop.f32.mrf.mxu1 }
0x1682   :  { %v2904_v60 = vadd.f32 %v3125_v56, %v2903_v59 }
0x1683   :  { %v3534_v61 = vpop.f32.mrf.mxu1 }
0x1684   :  { %v2908_v1 = vmax.f32 %v2904_v60, 0.0 }
0x1686   :  { %v2909_v2 = vpack.c.bf16 %v2908_v1, %v2907_v63 }
0x1688   :  { %3538 = vmatmul.mubr.msk.bf16.vlgmr.msra.gmra.mxu0 %vm391_vm2, %v2909_v2 }
0x1748   :  { %v2959_v4 = vpop.f32.mrf.mxu0 }
0x1749   :  { %v2960_v7 = vadd.f32 %v3128_v3, %v2959_v4 }
0x174a   :  { %v3539_v8 = vpop.f32.mrf.mxu0 }
0x174b   :  { %2966 = vst [vmem:[%s4456_s23] sm:$0xff] %v2960_v7 }
0x174c   :  { %v2962_v9 = vpop.f32.mrf.mxu0 }
0x174d   :  { %v2963_v10 = vadd.f32 %v3128_v3, %v2962_v9 }
0x174e   :  { %v3540_v11 = vpop.f32.mrf.mxu0 }
0x174f   :  { %2967 = vst [vmem:[%s4456_s23 + $0x8] sm:$0xff] %v2963_v10 }

</bundles_post_ra>
